<compile_context>
chip_gen: v7x
topology: tpu7x:2x2x1
jax: 0.10.0
libtpu: 0.0.40
codegen_flags: <defaults>
</compile_context>

<pallas_src>
import functools

import numpy as np

import jax
import jax.numpy as jnp
from jax.experimental import pallas as pl
from jax.experimental.pallas import tpu as pltpu

LANES = 128
_TILE_ROWS = 2048        # (2048,128) f32 block = 1 MiB per input buffer.
_SMALL_N = 1 << 16       # below ~256 KiB of f32, plain jnp beats a kernel launch.


def _round_up(x, m):
    return ((x + m - 1) // m) * m


# ----------------------------------------------------------------------------
# Forward: head_type == 'supervise'  ->  identity (no HBM round trip).
# ----------------------------------------------------------------------------
def denoiser_head_forward(base_output, head_type="supervise"):
    if head_type != "supervise":
        raise TypeError
    return base_output


# ----------------------------------------------------------------------------
# Loss kernels: each grid step reduces one lane-dense (tile_rows, 128) block of
# f((o*m) - (t*m)) to an independent (8, 128) f32 partial.  Ragged last block
# (rows % tile_rows != 0) is handled by zeroing out-of-range rows in-kernel.
# ----------------------------------------------------------------------------
def _masked_loss_kernel(o_ref, t_ref, m_ref, p_ref, *, loss_type, total_rows,
                        tile_rows):
    o = o_ref[...].astype(jnp.float32)
    t = t_ref[...].astype(jnp.float32)
    m = m_ref[...].astype(jnp.float32)
    diff = o * m - t * m                       # matches torch: out*mask - target*mask
    val = diff * diff if loss_type == "l2" else jnp.abs(diff)
    if total_rows % tile_rows:                 # static check: ragged last block
        row = (pl.program_id(0) * tile_rows
               + jax.lax.broadcasted_iota(jnp.int32, val.shape, 0))
        val = jnp.where(row < total_rows, val, 0.0)
    p_ref[...] = val.reshape(tile_rows // 8, 8, LANES).sum(axis=0)


def _unmasked_loss_kernel(o_ref, t_ref, p_ref, *, loss_type, total_rows,
                          tile_rows):
    diff = o_ref[...].astype(jnp.float32) - t_ref[...].astype(jnp.float32)
    val = diff * diff if loss_type == "l2" else jnp.abs(diff)
    if total_rows % tile_rows:
        row = (pl.program_id(0) * tile_rows
               + jax.lax.broadcasted_iota(jnp.int32, val.shape, 0))
        val = jnp.where(row < total_rows, val, 0.0)
    p_ref[...] = val.reshape(tile_rows // 8, 8, LANES).sum(axis=0)


# ----------------------------------------------------------------------------
# Plain-jnp element-sum of f(o*m - t*m)  (fast path for tiny inputs + ragged tail).
# ----------------------------------------------------------------------------
def _elementwise_loss_sum(o, t, m, loss_type):
    o = o.astype(jnp.float32)
    t = t.astype(jnp.float32)
    if m is not None:
        m = m.astype(jnp.float32)
        o = o * m
        t = t * m
    d = o - t
    v = d * d if loss_type == "l2" else jnp.abs(d)
    return jnp.sum(v)


# ----------------------------------------------------------------------------
# Pallas reduction path.
# ----------------------------------------------------------------------------
def _pallas_loss_sum(output, target, mask, loss_type):
    n = output.size
    rows = n // LANES
    tail = n - rows * LANES          # < 128 leftover elements handled in plain jnp
    main = rows * LANES

    if mask is not None and mask.dtype == jnp.bool_:
        # 1-byte stream; avoids i1 refs in the kernel while keeping DMA narrow.
        mask = mask.astype(jnp.int8)

    operands_nd = [output, target] + ([mask] if mask is not None else [])
    # Sublane alignment for the block depends on the narrowest dtype streamed:
    # 4-byte -> 8 rows, 2-byte -> 16, 1-byte -> 32.
    align = 8
    for a in operands_nd:
        isz = np.dtype(a.dtype).itemsize
        if 0 < isz < 4:
            align = max(align, 8 * (4 // isz))
    tile_rows = min(_TILE_ROWS, _round_up(rows, align))
    grid = pl.cdiv(rows, tile_rows)

    def to2d(x):
        flat = x.reshape(-1)
        body = flat[:main] if tail else flat   # no zero-pad concatenate anymore
        return body.reshape(rows, LANES)

    o2d = to2d(output)
    t2d = to2d(target)

    in_block = pl.BlockSpec((tile_rows, LANES), lambda i: (i, 0))
    out_block = pl.BlockSpec((8, LANES), lambda i: (i, 0))

    if mask is None:
        kernel = functools.partial(_unmasked_loss_kernel, loss_type=loss_type,
                                   total_rows=rows, tile_rows=tile_rows)
        in_specs = [in_block, in_block]
        operands = (o2d, t2d)
    else:
        kernel = functools.partial(_masked_loss_kernel, loss_type=loss_type,
                                   total_rows=rows, tile_rows=tile_rows)
        in_specs = [in_block, in_block, in_block]
        operands = (o2d, t2d, to2d(mask))

    def run(semantics):
        return pl.pallas_call(
            kernel,
            out_shape=jax.ShapeDtypeStruct((grid * 8, LANES), jnp.float32),
            grid_spec=pltpu.PrefetchScalarGridSpec(
                num_scalar_prefetch=0,
                grid=(grid,),
                in_specs=in_specs,
                out_specs=out_block,
            ),
            compiler_params=pltpu.CompilerParams(
                dimension_semantics=semantics),
        )(*operands)

    partials = None
    if grid > 1:
        # v7x: shard independent grid steps across both TensorCores.  Every step
        # writes its own disjoint (8,128) partial, so this is race-free.  On
        # single-core parts / unsupported lowerings fall back below.
        try:
            partials = jax.block_until_ready(run((pltpu.CORE_PARALLEL,)))
        except Exception:
            partials = None
    if partials is None:
        partials = run((pltpu.PARALLEL,))

    total = jnp.sum(partials)

    if tail:
        def tail_of(x):
            return x.reshape(-1)[main:]
        total = total + _elementwise_loss_sum(
            tail_of(output), tail_of(target),
            tail_of(mask) if mask is not None else None, loss_type)
    return total


# ----------------------------------------------------------------------------
# Public loss wrapper mirroring DenoiserHead.loss().
# ----------------------------------------------------------------------------
def denoiser_head_loss(base_output, target, mask=None, loss_type="l2",
                       loss_weight=1.0, small_n_threshold=_SMALL_N):
    if loss_type not in ("l2", "l1"):
        raise TypeError
    # 'supervise' head: forward is identity — no copy kernel in the loss path.
    output = denoiser_head_forward(base_output)
    n = output.size

    if n < small_n_threshold or (n // LANES) == 0:
        total = _elementwise_loss_sum(output, target, mask, loss_type)
    else:
        total = _pallas_loss_sum(output, target, mask, loss_type)

    mean = total / jnp.float32(n)
    loss_val = mean + mean          # loss_func(out, tgt) + loss_func(out, tgt)
    # PyTorch DenoiserHead stores loss_weight ('loss_wight') but never applies it.
    del loss_weight

    loss = {loss_type: loss_val, "loss_total": loss_val}
    model_info = {}
    return loss, model_info


# ----------------------------------------------------------------------------
# float64 numpy reference for correctness checking.
# ----------------------------------------------------------------------------
def _ref_loss(x, t, m, loss_type):
    x = np.asarray(x, np.float64)
    t = np.asarray(t, np.float64)
    if m is not None:
        m = np.asarray(m, np.float64)
        x = x * m
        t = t * m
    d = x - t
    v = d * d if loss_type == "l2" else np.abs(d)
    l = v.mean()
    return l + l


if __name__ == "__main__":
    root = jax.random.PRNGKey(0)
    ok = True

    # Forward ('supervise' head): identity pass-through.
    xf = jax.random.normal(root, (2, 4, 16, 16), dtype=jnp.float32)
    out = jax.block_until_ready(denoiser_head_forward(xf))
    ok &= (out.shape == xf.shape and out.dtype == xf.dtype
           and bool(jnp.allclose(out, xf)))

    # (shape, mask dtype or None for unmasked).
    cases = [
        ((2, 4, 16, 16), jnp.float32),    # tiny   -> fused-jnp fast path, masked
        ((2, 4, 16, 16), None),           # tiny   -> fast path, unmasked
        ((2, 8, 64, 128), jnp.float32),   # kernel -> aligned rows, f32 mask
        ((2, 8, 64, 128), jnp.int8),      # kernel -> 1-byte mask stream
        ((2, 8, 64, 128), None),          # kernel -> unmasked 2-input variant
        ((4, 8, 128, 128), jnp.int8),     # kernel -> grid > 1 (CORE_PARALLEL path)
        ((3, 5, 67, 71), jnp.float32),    # kernel -> n % 128 != 0 (ragged tail/block)
    ]
    keys = jax.random.split(root, len(cases))
    for (shape, mask_dtype), k in zip(cases, keys):
        k1, k2, k3 = jax.random.split(k, 3)
        x = jax.random.normal(k1, shape, dtype=jnp.float32)
        t = jax.random.normal(k2, shape, dtype=jnp.float32)
        if mask_dtype is None:
            mask = None
        else:
            mask = (jax.random.uniform(k3, shape) > 0.3).astype(mask_dtype)
        for loss_type in ("l2", "l1"):
            loss_dict, _ = denoiser_head_loss(x, t, mask, loss_type=loss_type,
                                              loss_weight=1.0)
            got = float(jax.block_until_ready(loss_dict["loss_total"]))
            want = _ref_loss(x, t, mask, loss_type)
            if not np.isclose(got, want, rtol=1e-4, atol=1e-6):
                ok = False
                print(f"MISMATCH shape={shape} mask={mask_dtype} {loss_type}: "
                      f"got={got} want={want}")

    if ok:
        print("KERNEL_OK")
</pallas_src>

<mosaic_0001>
module attributes {stable_mosaic.version = 11 : i64} {
  func.func @_masked_loss_kernel(%arg0: i32, %arg1: memref<1024x128xf32, #tpu.memory_space<vmem>>, %arg2: memref<1024x128xf32, #tpu.memory_space<vmem>>, %arg3: memref<1024x128xf32, #tpu.memory_space<vmem>>, %arg4: memref<8x128xf32, #tpu.memory_space<vmem>>) attributes {dimension_semantics = [#tpu.dimension_semantics<parallel>], iteration_bounds = array<i64: 1>, scalar_prefetch = 0 : i64, scratch_operands = 0 : i64, tpu.core_type = #tpu.core_type<tc>, window_params = [{transform_indices = @transform_0, window_bounds = array<i64: 1024, 128>}, {transform_indices = @transform_1, window_bounds = array<i64: 1024, 128>}, {transform_indices = @transform_2, window_bounds = array<i64: 1024, 128>}, {transform_indices = @transform_3, window_bounds = array<i64: 8, 128>}]} {
    %c0 = arith.constant 0 : index
    %c0_0 = arith.constant 0 : index
    %0 = vector.load %arg1[%c0, %c0_0] : memref<1024x128xf32, #tpu.memory_space<vmem>>, vector<1024x128xf32>
    %c0_1 = arith.constant 0 : index
    %c0_2 = arith.constant 0 : index
    %1 = vector.load %arg2[%c0_1, %c0_2] : memref<1024x128xf32, #tpu.memory_space<vmem>>, vector<1024x128xf32>
    %c0_3 = arith.constant 0 : index
    %c0_4 = arith.constant 0 : index
    %2 = vector.load %arg3[%c0_3, %c0_4] : memref<1024x128xf32, #tpu.memory_space<vmem>>, vector<1024x128xf32>
    %3 = arith.mulf %0, %2 : vector<1024x128xf32>
    %4 = arith.mulf %1, %2 : vector<1024x128xf32>
    %5 = arith.subf %3, %4 : vector<1024x128xf32>
    %6 = arith.mulf %5, %5 : vector<1024x128xf32>
    %7 = vector.shape_cast %6 : vector<1024x128xf32> to vector<128x8x128xf32>
    %cst = arith.constant dense<0.000000e+00> : vector<8x128xf32>
    %8 = vector.multi_reduction <add>, %7, %cst [0] : vector<128x8x128xf32> to vector<8x128xf32>
    %c0_5 = arith.constant 0 : index
    %c0_6 = arith.constant 0 : index
    %9 = vector.load %arg4[%c0_5, %c0_6] : memref<8x128xf32, #tpu.memory_space<vmem>>, vector<8x128xf32>
    tpu.vector_store %arg4[%c0_5, %c0_6], %8 {strides = array<i32>} : memref<8x128xf32, #tpu.memory_space<vmem>>, vector<8x128xf32>,
    return
  }
  func.func @transform_0(%arg0: i32) -> (i32, i32) {
    %c0_i32 = arith.constant 0 : i32
    %c0_i32_0 = arith.constant 0 : i32
    return %arg0, %c0_i32 : i32, i32
  }
  func.func @transform_1(%arg0: i32) -> (i32, i32) {
    %c0_i32 = arith.constant 0 : i32
    %c0_i32_0 = arith.constant 0 : i32
    return %arg0, %c0_i32 : i32, i32
  }
  func.func @transform_2(%arg0: i32) -> (i32, i32) {
    %c0_i32 = arith.constant 0 : i32
    %c0_i32_0 = arith.constant 0 : i32
    return %arg0, %c0_i32 : i32, i32
  }
  func.func @transform_3(%arg0: i32) -> (i32, i32) {
    %c0_i32 = arith.constant 0 : i32
    %c0_i32_0 = arith.constant 0 : i32
    return %arg0, %c0_i32 : i32, i32
  }
}

</mosaic_0001>

<bundles_post_ra>
// kernel: tpu_custom_call.1
= control target key start
LH: loop header
LB: loop body
LE: loop exit
PB: predicated region body
PF: predicated region fallthrough
CT: control target
= control target key end

     0   :  { %8 = vsyncpa [#allocation3], 0  ;;  %s1286_s0 = inlined_call_operand.hbm [shape: f32[1024,128], index: 0, kind: input, shape index: {}]   ;;  %s1287_s1 = inlined_call_operand.hbm [shape: f32[1024,128], index: 1, kind: input, shape index: {}]   ;;  %s1288_s2 = inlined_call_operand.hbm [shape: f32[1024,128], index: 2, kind: input, shape index: {}]   ;;  %s1289_s3 = inlined_call_operand.hbm [shape: f32[8,128], index: 3, kind: output, shape index: {}]  }
   0x1   :  { %9 = vsyncpa [#allocation6], 0 }
   0x2   :  { %10 = vsyncpa [#allocation4], 0  ;;  %s1196_s12 = smov [#allocation5]   ;;  %s1197_s14 = smov [#allocation2]  }
   0x3   :  { %s28_s13 = sshll.u32 %s1196_s12, 4  ;;  %s16_s15 = sshll.u32 %s1197_s14, 4  ;;  %s29_s13 = int_to_ptr.vmem [resolvable:$true] %s28_s13  ;;  %s1222_s15 = int_to_ptr.vmem [resolvable:$true] %s16_s15 }
   0x4   :  { %s1102_s18 = scalar_lea.hbm %s1287_s1, 16384 }
   0x5   :  { %p1103_p0 = scmp.ne.s32.totalorder %s1287_s1, %s1102_s18  ;;  %p1106_p1 = scmp.lt.u32.totalorder %s1102_s18, %s1287_s1 }
   0x7   :  { %p1108_p2 = pnand %p1106_p1, %p1103_p0 }
   0x9   :  { %1111 = shalt.err (!%p1108_p2)
}
   0xa   :  { %s1112_s23 = scalar_lea.vmem %s29_s13, 16384  ;;  %p1117_p4 = scmp.lt.s32.totalorder %s29_s13, %s29_s13 }
   0xb   :  { %p1113_p3 = scmp.ne.s32.totalorder %s29_s13, %s1112_s23  ;;  %p1118_p5 = scmp.lt.s32.totalorder %s1112_s23, %s1112_s23 }
   0xd   :  { %p1119_p6 = por %p1118_p5, %p1117_p4 }
   0xf   :  { %p1120_p7 = pnand %p1119_p6, %p1113_p3 }
  0x11   :  { %1123 = shalt.err (!%p1120_p7)
}
  0x12   :  { %s1198_s24 = smov 128   ;;  %s1199_s25 = smov 8  }
  0x13   :  { %34 = dma.hbm_to_vmem [thread:$0]  %s1287_s1, 16384, %s29_s13, [#allocation6], %s1198_s24, %s1198_s24, %s1199_s25  }
  0x14   :  { %s1124_s30 = scalar_lea.hbm %s1286_s0, 16384 }
  0x15   :  { %p1125_p8 = scmp.ne.s32.totalorder %s1286_s0, %s1124_s30  ;;  %p1128_p9 = scmp.lt.u32.totalorder %s1124_s30, %s1286_s0 }
  0x17   :  { %p1130_p10 = pnand %p1128_p9, %p1125_p8 }
  0x19   :  { %1133 = shalt.err (!%p1130_p10)
}
  0x1a   :  { %s1134_s8 = scalar_lea.vmem %s1222_s15, 16384  ;;  %p1139_p12 = scmp.lt.s32.totalorder %s1222_s15, %s1222_s15 }
  0x1b   :  { %p1135_p11 = scmp.ne.s32.totalorder %s1222_s15, %s1134_s8  ;;  %p1140_p13 = scmp.lt.s32.totalorder %s1134_s8, %s1134_s8 }
  0x1d   :  { %p1141_p0 = por %p1140_p13, %p1139_p12 }
  0x1f   :  { %p1142_p1 = pnand %p1141_p0, %p1135_p11 }
  0x21   :  { %1145 = shalt.err (!%p1142_p1)
}
  0x22   :  { %22 = dma.hbm_to_vmem [thread:$0]  %s1286_s0, 16384, %s1222_s15, [#allocation3], %s1198_s24, %s1198_s24, %s1199_s25  }
  0x23   :  { %s1200_s10 = smov [#allocation7]   ;;  %s1146_s14 = scalar_lea.hbm %s1288_s2, 16384 }
  0x24   :  { %s40_s11 = sshll.u32 %s1200_s10, 4  ;;  %p1147_p2 = scmp.ne.s32.totalorder %s1288_s2, %s1146_s14  ;;  %s41_s11 = int_to_ptr.vmem [resolvable:$true] %s40_s11 }
  0x25   :  { %p1150_p3 = scmp.lt.u32.totalorder %s1146_s14, %s1288_s2 }
  0x27   :  { %p1152_p4 = pnand %p1150_p3, %p1147_p2 }
  0x29   :  { %1155 = shalt.err (!%p1152_p4)
}
  0x2a   :  { %s1156_s20 = scalar_lea.vmem %s41_s11, 16384  ;;  %p1161_p6 = scmp.lt.s32.totalorder %s41_s11, %s41_s11 }
  0x2b   :  { %p1157_p5 = scmp.ne.s32.totalorder %s41_s11, %s1156_s20  ;;  %p1162_p7 = scmp.lt.s32.totalorder %s1156_s20, %s1156_s20 }
  0x2d   :  { %p1163_p8 = por %p1162_p7, %p1161_p6 }
  0x2f   :  { %p1164_p9 = pnand %p1163_p8, %p1157_p5 }
  0x31   :  { %1167 = shalt.err (!%p1164_p9)
}
  0x32   :  { %46 = dma.hbm_to_vmem [thread:$0]  %s1288_s2, 16384, %s41_s11, [#allocation6], %s1198_s24, %s1198_s24, %s1199_s25  }
  0x33   :  { %1190 = dma.done.wait [#allocation3], 16384  }
  0x34   :  { %1191 = vsyncadd [#allocation3], 4294950912 }
  0x35   :  { %1192 = dma.done.wait [#allocation6], 32768  }
  0x36   :  { %1193 = vsyncadd [#allocation6], 4294934528  ;;  %v56_v0 = vld [vmem:[#allocation2] sm:$0xff]  ;;  %v57_v1 = vld [vmem:[#allocation2 + $0x8] sm:$0xff]  ;;  %s1201_s2 = smov [#allocation8]  }
  0x37   :  { %v184_v2 = vld [vmem:[#allocation5] sm:$0xff]  ;;  %v185_v3 = vld [vmem:[#allocation5 + $0x8] sm:$0xff]  ;;  %v58_v6 = vld [vmem:[#allocation2 + $0x10] sm:$0xff]  ;;  %s1086_s21 = sshll.u32 %s1201_s2, 4  ;;  %s1087_s21 = int_to_ptr.vmem [resolvable:$true] %s1086_s21 }
  0x38   :  { %v312_v4 = vld [vmem:[#allocation7] sm:$0xff]  ;;  %v313_v5 = vld [vmem:[#allocation7 + $0x8] sm:$0xff]  ;;  %v186_v7 = vld [vmem:[#allocation5 + $0x10] sm:$0xff]  ;;  %s1168_s22 = scalar_lea.vmem %s1087_s21, 128  ;;  %p1173_p11 = scmp.lt.s32.totalorder %s1087_s21, %s1087_s21 }
  0x39   :  { %v314_v8 = vld [vmem:[#allocation7 + $0x10] sm:$0xff]  ;;  %v440_v9 = vmul.f32 %v312_v4, %v56_v0  ;;  %v441_v10 = vmul.f32 %v313_v5, %v57_v1  ;;  %v568_v11 = vmul.f32 %v312_v4, %v184_v2  ;;  %v569_v12 = vmul.f32 %v313_v5, %v185_v3  ;;  %v59_v13 = vld [vmem:[#allocation2 + $0x18] sm:$0xff]  ;;  %v60_v18 = vld [vmem:[#allocation2 + $0x20] sm:$0xff]  ;;  %p1169_p10 = scmp.ne.s32.totalorder %s1087_s21, %s1168_s22  ;;  %p1174_p12 = scmp.lt.s32.totalorder %s1168_s22, %s1168_s22 }
  0x3a   :  { %v187_v14 = vld [vmem:[#allocation5 + $0x18] sm:$0xff]  ;;  %v442_v16 = vmul.f32 %v314_v8, %v58_v6  ;;  %v570_v17 = vmul.f32 %v314_v8, %v186_v7  ;;  %v188_v19 = vld [vmem:[#allocation5 + $0x20] sm:$0xff]  ;;  %v61_v21 = vld [vmem:[#allocation2 + $0x28] sm:$0xff] }
  0x3b   :  { %v315_v15 = vld [vmem:[#allocation7 + $0x18] sm:$0xff]  ;;  %v316_v20 = vld [vmem:[#allocation7 + $0x20] sm:$0xff]  ;;  %v317_v22 = vld [vmem:[#allocation7 + $0x28] sm:$0xff]  ;;  %v696_v25 = vsub.f32 %v440_v9, %v568_v11  ;;  %v697_v26 = vsub.f32 %v441_v10, %v569_v12  ;;  %p1175_p13 = por %p1174_p12, %p1173_p11 }
  0x3c   :  { %v443_v23 = vmul.f32 %v315_v15, %v59_v13  ;;  %v571_v24 = vmul.f32 %v315_v15, %v187_v14  ;;  %v189_v27 = vld [vmem:[#allocation5 + $0x28] sm:$0xff]  ;;  %v444_v28 = vmul.f32 %v316_v20, %v60_v18  ;;  %v572_v29 = vmul.f32 %v316_v20, %v188_v19  ;;  %v62_v31 = vld [vmem:[#allocation2 + $0x30] sm:$0xff]  ;;  %v63_v35 = vld [vmem:[#allocation2 + $0x38] sm:$0xff] }
  0x3d   :  { %v698_v30 = vsub.f32 %v442_v16, %v570_v17  ;;  %v190_v32 = vld [vmem:[#allocation5 + $0x30] sm:$0xff]  ;;  %v445_v34 = vmul.f32 %v317_v22, %v61_v21  ;;  %v319_v36 = vld [vmem:[#allocation7 + $0x38] sm:$0xff]  ;;  %v573_v37 = vmul.f32 %v317_v22, %v189_v27  ;;  %v824_v39 = vmul.f32 %v696_v25, %v696_v25  ;;  %v64_v42 = vld [vmem:[#allocation2 + $0x40] sm:$0xff]  ;;  %p1176_p0 = pnand %p1175_p13, %p1169_p10 }
  0x3e   :  { %v318_v33 = vld [vmem:[#allocation7 + $0x30] sm:$0xff]  ;;  %v699_v38 = vsub.f32 %v443_v23, %v571_v24  ;;  %v825_v40 = vmul.f32 %v697_v26, %v697_v26  ;;  %v191_v41 = vld [vmem:[#allocation5 + $0x38] sm:$0xff]  ;;  %v320_v43 = vld [vmem:[#allocation7 + $0x40] sm:$0xff]  ;;  %v700_v46 = vsub.f32 %v444_v28, %v572_v29  ;;  %v447_v49 = vmul.f32 %v319_v36, %v63_v35 }
  0x3f   :  { %v446_v44 = vmul.f32 %v318_v33, %v62_v31  ;;  %v574_v45 = vmul.f32 %v318_v33, %v190_v32  ;;  %v826_v47 = vmul.f32 %v698_v30, %v698_v30  ;;  %v192_v48 = vld [vmem:[#allocation5 + $0x40] sm:$0xff]  ;;  %v65_v50 = vld [vmem:[#allocation2 + $0x48] sm:$0xff]  ;;  %v575_v52 = vmul.f32 %v319_v36, %v191_v41  ;;  %v66_v58 = vld [vmem:[#allocation2 + $0x50] sm:$0xff] }
  0x40   :  { %v321_v51 = vld [vmem:[#allocation7 + $0x48] sm:$0xff]  ;;  %v701_v53 = vsub.f32 %v445_v34, %v573_v37  ;;  %v827_v54 = vmul.f32 %v699_v38, %v699_v38  ;;  %v952_v55 = vadd.f32 %v825_v40, %v824_v39  ;;  %v448_v57 = vmul.f32 %v320_v43, %v64_v42  ;;  %v322_v59 = vld [vmem:[#allocation7 + $0x50] sm:$0xff]  ;;  %v67_v2 = vld [vmem:[#allocation2 + $0x58] sm:$0xff] }
  0x41   :  { %v193_v56 = vld [vmem:[#allocation5 + $0x48] sm:$0xff]  ;;  %v576_v60 = vmul.f32 %v320_v43, %v192_v48  ;;  %v702_v61 = vsub.f32 %v446_v44, %v574_v45  ;;  %v828_v62 = vmul.f32 %v700_v46, %v700_v46  ;;  %v194_v0 = vld [vmem:[#allocation5 + $0x50] sm:$0xff]  ;;  %v449_v1 = vmul.f32 %v321_v51, %v65_v50  ;;  %v323_v3 = vld [vmem:[#allocation7 + $0x58] sm:$0xff] }
  0x42   :  { %v953_v63 = vadd.f32 %v952_v55, %v826_v47  ;;  %v577_v4 = vmul.f32 %v321_v51, %v193_v56  ;;  %v703_v5 = vsub.f32 %v447_v49, %v575_v52  ;;  %v829_v6 = vmul.f32 %v701_v53, %v701_v53  ;;  %v195_v8 = vld [vmem:[#allocation5 + $0x58] sm:$0xff]  ;;  %v68_v10 = vld [vmem:[#allocation2 + $0x60] sm:$0xff]  ;;  %v69_v18 = vld [vmem:[#allocation2 + $0x68] sm:$0xff] }
  0x43   :  { %v450_v9 = vmul.f32 %v322_v59, %v66_v58  ;;  %v324_v11 = vld [vmem:[#allocation7 + $0x60] sm:$0xff]  ;;  %v578_v12 = vmul.f32 %v322_v59, %v194_v0  ;;  %v704_v13 = vsub.f32 %v448_v57, %v576_v60  ;;  %v830_v14 = vmul.f32 %v702_v61, %v702_v61  ;;  %v325_v19 = vld [vmem:[#allocation7 + $0x68] sm:$0xff]  ;;  %v70_v26 = vld [vmem:[#allocation2 + $0x70] sm:$0xff] }
  0x44   :  { %v954_v7 = vadd.f32 %v953_v63, %v827_v54  ;;  %v196_v16 = vld [vmem:[#allocation5 + $0x60] sm:$0xff]  ;;  %v451_v17 = vmul.f32 %v323_v3, %v67_v2  ;;  %v579_v20 = vmul.f32 %v323_v3, %v195_v8  ;;  %v705_v21 = vsub.f32 %v449_v1, %v577_v4  ;;  %v197_v24 = vld [vmem:[#allocation5 + $0x68] sm:$0xff]  ;;  %v326_v27 = vld [vmem:[#allocation7 + $0x70] sm:$0xff] }
  0x45   :  { %v831_v22 = vmul.f32 %v703_v5, %v703_v5  ;;  %v452_v25 = vmul.f32 %v324_v11, %v68_v10  ;;  %v580_v28 = vmul.f32 %v324_v11, %v196_v16  ;;  %v706_v29 = vsub.f32 %v450_v9, %v578_v12  ;;  %v198_v32 = vld [vmem:[#allocation5 + $0x70] sm:$0xff]  ;;  %v71_v34 = vld [vmem:[#allocation2 + $0x78] sm:$0xff]  ;;  %v72_v42 = vld [vmem:[#allocation2 + $0x80] sm:$0xff] }
  0x46   :  { %v955_v15 = vadd.f32 %v954_v7, %v828_v62  ;;  %v832_v30 = vmul.f32 %v704_v13, %v704_v13  ;;  %v453_v33 = vmul.f32 %v325_v19, %v69_v18  ;;  %v327_v35 = vld [vmem:[#allocation7 + $0x78] sm:$0xff]  ;;  %v581_v36 = vmul.f32 %v325_v19, %v197_v24  ;;  %v328_v43 = vld [vmem:[#allocation7 + $0x80] sm:$0xff]  ;;  %v73_v50 = vld [vmem:[#allocation2 + $0x88] sm:$0xff] }
  0x47   :  { %v707_v37 = vsub.f32 %v451_v17, %v579_v20  ;;  %v833_v38 = vmul.f32 %v705_v21, %v705_v21  ;;  %v199_v40 = vld [vmem:[#allocation5 + $0x78] sm:$0xff]  ;;  %v454_v41 = vmul.f32 %v326_v27, %v70_v26  ;;  %v582_v44 = vmul.f32 %v326_v27, %v198_v32  ;;  %v200_v48 = vld [vmem:[#allocation5 + $0x80] sm:$0xff]  ;;  %v329_v51 = vld [vmem:[#allocation7 + $0x88] sm:$0xff] }
  0x48   :  { %v956_v23 = vadd.f32 %v955_v15, %v829_v6  ;;  %v708_v45 = vsub.f32 %v452_v25, %v580_v28  ;;  %v834_v46 = vmul.f32 %v706_v29, %v706_v29  ;;  %v455_v49 = vmul.f32 %v327_v35, %v71_v34  ;;  %v201_v56 = vld [vmem:[#allocation5 + $0x88] sm:$0xff]  ;;  %v74_v58 = vld [vmem:[#allocation2 + $0x90] sm:$0xff]  ;;  %v75_v2 = vld [vmem:[#allocation2 + $0x98] sm:$0xff] }
  0x49   :  { %v583_v52 = vmul.f32 %v327_v35, %v199_v40  ;;  %v709_v53 = vsub.f32 %v453_v33, %v581_v36  ;;  %v835_v54 = vmul.f32 %v707_v37, %v707_v37  ;;  %v456_v57 = vmul.f32 %v328_v43, %v72_v42  ;;  %v330_v59 = vld [vmem:[#allocation7 + $0x90] sm:$0xff]  ;;  %v331_v3 = vld [vmem:[#allocation7 + $0x98] sm:$0xff]  ;;  %v76_v10 = vld [vmem:[#allocation2 + $0xa0] sm:$0xff] }
  0x4a   :  { %v957_v31 = vadd.f32 %v956_v23, %v830_v14  ;;  %v584_v60 = vmul.f32 %v328_v43, %v200_v48  ;;  %v710_v61 = vsub.f32 %v454_v41, %v582_v44  ;;  %v836_v62 = vmul.f32 %v708_v45, %v708_v45  ;;  %v202_v0 = vld [vmem:[#allocation5 + $0x90] sm:$0xff]  ;;  %v203_v8 = vld [vmem:[#allocation5 + $0x98] sm:$0xff]  ;;  %v332_v11 = vld [vmem:[#allocation7 + $0xa0] sm:$0xff] }
  0x4b   :  { %v457_v1 = vmul.f32 %v329_v51, %v73_v50  ;;  %v585_v4 = vmul.f32 %v329_v51, %v201_v56  ;;  %v711_v5 = vsub.f32 %v455_v49, %v583_v52  ;;  %v837_v6 = vmul.f32 %v709_v53, %v709_v53  ;;  %v204_v16 = vld [vmem:[#allocation5 + $0xa0] sm:$0xff]  ;;  %v77_v18 = vld [vmem:[#allocation2 + $0xa8] sm:$0xff]  ;;  %v78_v26 = vld [vmem:[#allocation2 + $0xb0] sm:$0xff] }
  0x4c   :  { %v958_v39 = vadd.f32 %v957_v31, %v831_v22  ;;  %v458_v9 = vmul.f32 %v330_v59, %v74_v58  ;;  %v586_v12 = vmul.f32 %v330_v59, %v202_v0  ;;  %v712_v13 = vsub.f32 %v456_v57, %v584_v60  ;;  %v333_v19 = vld [vmem:[#allocation7 + $0xa8] sm:$0xff]  ;;  %v334_v27 = vld [vmem:[#allocation7 + $0xb0] sm:$0xff]  ;;  %v79_v34 = vld [vmem:[#allocation2 + $0xb8] sm:$0xff] }
  0x4d   :  { %v838_v14 = vmul.f32 %v710_v61, %v710_v61  ;;  %v459_v17 = vmul.f32 %v331_v3, %v75_v2  ;;  %v587_v20 = vmul.f32 %v331_v3, %v203_v8  ;;  %v713_v21 = vsub.f32 %v457_v1, %v585_v4  ;;  %v205_v24 = vld [vmem:[#allocation5 + $0xa8] sm:$0xff]  ;;  %v206_v32 = vld [vmem:[#allocation5 + $0xb0] sm:$0xff]  ;;  %v335_v35 = vld [vmem:[#allocation7 + $0xb8] sm:$0xff] }
  0x4e   :  { %v959_v47 = vadd.f32 %v958_v39, %v832_v30  ;;  %v839_v22 = vmul.f32 %v711_v5, %v711_v5  ;;  %v460_v25 = vmul.f32 %v332_v11, %v76_v10  ;;  %v588_v28 = vmul.f32 %v332_v11, %v204_v16  ;;  %v207_v40 = vld [vmem:[#allocation5 + $0xb8] sm:$0xff]  ;;  %v80_v42 = vld [vmem:[#allocation2 + $0xc0] sm:$0xff]  ;;  %v81_v50 = vld [vmem:[#allocation2 + $0xc8] sm:$0xff] }
  0x4f   :  { %v714_v29 = vsub.f32 %v458_v9, %v586_v12  ;;  %v840_v30 = vmul.f32 %v712_v13, %v712_v13  ;;  %v461_v33 = vmul.f32 %v333_v19, %v77_v18  ;;  %v589_v36 = vmul.f32 %v333_v19, %v205_v24  ;;  %v336_v43 = vld [vmem:[#allocation7 + $0xc0] sm:$0xff]  ;;  %v337_v51 = vld [vmem:[#allocation7 + $0xc8] sm:$0xff]  ;;  %v82_v58 = vld [vmem:[#allocation2 + $0xd0] sm:$0xff] }
  0x50   :  { %v960_v55 = vadd.f32 %v959_v47, %v833_v38  ;;  %v715_v37 = vsub.f32 %v459_v17, %v587_v20  ;;  %v841_v38 = vmul.f32 %v713_v21, %v713_v21  ;;  %v462_v41 = vmul.f32 %v334_v27, %v78_v26  ;;  %v208_v48 = vld [vmem:[#allocation5 + $0xc0] sm:$0xff]  ;;  %v209_v56 = vld [vmem:[#allocation5 + $0xc8] sm:$0xff]  ;;  %v338_v59 = vld [vmem:[#allocation7 + $0xd0] sm:$0xff] }
  0x51   :  { %v590_v44 = vmul.f32 %v334_v27, %v206_v32  ;;  %v716_v45 = vsub.f32 %v460_v25, %v588_v28  ;;  %v463_v49 = vmul.f32 %v335_v35, %v79_v34  ;;  %v591_v52 = vmul.f32 %v335_v35, %v207_v40  ;;  %v210_v0 = vld [vmem:[#allocation5 + $0xd0] sm:$0xff]  ;;  %v83_v2 = vld [vmem:[#allocation2 + $0xd8] sm:$0xff]  ;;  %v84_v10 = vld [vmem:[#allocation2 + $0xe0] sm:$0xff] }
  0x52   :  { %v961_v63 = vadd.f32 %v960_v55, %v834_v46  ;;  %v842_v46 = vmul.f32 %v714_v29, %v714_v29  ;;  %v717_v53 = vsub.f32 %v461_v33, %v589_v36  ;;  %v464_v57 = vmul.f32 %v336_v43, %v80_v42  ;;  %v339_v3 = vld [vmem:[#allocation7 + $0xd8] sm:$0xff]  ;;  %v340_v11 = vld [vmem:[#allocation7 + $0xe0] sm:$0xff]  ;;  %v85_v18 = vld [vmem:[#allocation2 + $0xe8] sm:$0xff] }
  0x53   :  { %v592_v60 = vmul.f32 %v336_v43, %v208_v48  ;;  %v718_v61 = vsub.f32 %v462_v41, %v590_v44  ;;  %v465_v1 = vmul.f32 %v337_v51, %v81_v50  ;;  %v593_v4 = vmul.f32 %v337_v51, %v209_v56  ;;  %v211_v8 = vld [vmem:[#allocation5 + $0xd8] sm:$0xff]  ;;  %v212_v16 = vld [vmem:[#allocation5 + $0xe0] sm:$0xff]  ;;  %v341_v19 = vld [vmem:[#allocation7 + $0xe8] sm:$0xff] }
  0x54   :  { %v962_v7 = vadd.f32 %v961_v63, %v835_v54  ;;  %v843_v54 = vmul.f32 %v715_v37, %v715_v37  ;;  %v719_v5 = vsub.f32 %v463_v49, %v591_v52  ;;  %v466_v9 = vmul.f32 %v338_v59, %v82_v58  ;;  %v213_v24 = vld [vmem:[#allocation5 + $0xe8] sm:$0xff]  ;;  %v86_v26 = vld [vmem:[#allocation2 + $0xf0] sm:$0xff]  ;;  %v87_v34 = vld [vmem:[#allocation2 + $0xf8] sm:$0xff] }
  0x55   :  { %v594_v12 = vmul.f32 %v338_v59, %v210_v0  ;;  %v720_v13 = vsub.f32 %v464_v57, %v592_v60  ;;  %v467_v17 = vmul.f32 %v339_v3, %v83_v2  ;;  %v595_v20 = vmul.f32 %v339_v3, %v211_v8  ;;  %v342_v27 = vld [vmem:[#allocation7 + $0xf0] sm:$0xff]  ;;  %v343_v35 = vld [vmem:[#allocation7 + $0xf8] sm:$0xff]  ;;  %v88_v42 = vld [vmem:[#allocation2 + $0x100] sm:$0xff] }
  0x56   :  { %v963_v15 = vadd.f32 %v962_v7, %v836_v62  ;;  %v844_v62 = vmul.f32 %v716_v45, %v716_v45  ;;  %v721_v21 = vsub.f32 %v465_v1, %v593_v4  ;;  %v468_v25 = vmul.f32 %v340_v11, %v84_v10  ;;  %v214_v32 = vld [vmem:[#allocation5 + $0xf0] sm:$0xff]  ;;  %v215_v40 = vld [vmem:[#allocation5 + $0xf8] sm:$0xff]  ;;  %v344_v43 = vld [vmem:[#allocation7 + $0x100] sm:$0xff] }
  0x57   :  { %v596_v28 = vmul.f32 %v340_v11, %v212_v16  ;;  %v722_v29 = vsub.f32 %v466_v9, %v594_v12  ;;  %v469_v33 = vmul.f32 %v341_v19, %v85_v18  ;;  %v597_v36 = vmul.f32 %v341_v19, %v213_v24  ;;  %v216_v48 = vld [vmem:[#allocation5 + $0x100] sm:$0xff]  ;;  %v89_v50 = vld [vmem:[#allocation2 + $0x108] sm:$0xff]  ;;  %v90_v58 = vld [vmem:[#allocation2 + $0x110] sm:$0xff] }
  0x58   :  { %v964_v23 = vadd.f32 %v963_v15, %v837_v6  ;;  %v845_v6 = vmul.f32 %v717_v53, %v717_v53  ;;  %v723_v37 = vsub.f32 %v467_v17, %v595_v20  ;;  %v470_v41 = vmul.f32 %v342_v27, %v86_v26  ;;  %v345_v51 = vld [vmem:[#allocation7 + $0x108] sm:$0xff]  ;;  %v346_v59 = vld [vmem:[#allocation7 + $0x110] sm:$0xff]  ;;  %v91_v2 = vld [vmem:[#allocation2 + $0x118] sm:$0xff] }
  0x59   :  { %v598_v44 = vmul.f32 %v342_v27, %v214_v32  ;;  %v724_v45 = vsub.f32 %v468_v25, %v596_v28  ;;  %v471_v49 = vmul.f32 %v343_v35, %v87_v34  ;;  %v599_v52 = vmul.f32 %v343_v35, %v215_v40  ;;  %v217_v56 = vld [vmem:[#allocation5 + $0x108] sm:$0xff]  ;;  %v218_v0 = vld [vmem:[#allocation5 + $0x110] sm:$0xff]  ;;  %v347_v3 = vld [vmem:[#allocation7 + $0x118] sm:$0xff] }
  0x5a   :  { %v965_v31 = vadd.f32 %v964_v23, %v838_v14  ;;  %v846_v14 = vmul.f32 %v718_v61, %v718_v61  ;;  %v725_v53 = vsub.f32 %v469_v33, %v597_v36  ;;  %v472_v57 = vmul.f32 %v344_v43, %v88_v42  ;;  %v219_v8 = vld [vmem:[#allocation5 + $0x118] sm:$0xff]  ;;  %v92_v10 = vld [vmem:[#allocation2 + $0x120] sm:$0xff]  ;;  %v93_v18 = vld [vmem:[#allocation2 + $0x128] sm:$0xff] }
  0x5b   :  { %v600_v60 = vmul.f32 %v344_v43, %v216_v48  ;;  %v726_v61 = vsub.f32 %v470_v41, %v598_v44  ;;  %v473_v1 = vmul.f32 %v345_v51, %v89_v50  ;;  %v601_v4 = vmul.f32 %v345_v51, %v217_v56  ;;  %v348_v11 = vld [vmem:[#allocation7 + $0x120] sm:$0xff]  ;;  %v349_v19 = vld [vmem:[#allocation7 + $0x128] sm:$0xff]  ;;  %v94_v26 = vld [vmem:[#allocation2 + $0x130] sm:$0xff] }
  0x5c   :  { %v966_v39 = vadd.f32 %v965_v31, %v839_v22  ;;  %v847_v22 = vmul.f32 %v719_v5, %v719_v5  ;;  %v727_v5 = vsub.f32 %v471_v49, %v599_v52  ;;  %v474_v9 = vmul.f32 %v346_v59, %v90_v58  ;;  %v220_v16 = vld [vmem:[#allocation5 + $0x120] sm:$0xff]  ;;  %v221_v24 = vld [vmem:[#allocation5 + $0x128] sm:$0xff]  ;;  %v350_v27 = vld [vmem:[#allocation7 + $0x130] sm:$0xff] }
  0x5d   :  { %v602_v12 = vmul.f32 %v346_v59, %v218_v0  ;;  %v475_v17 = vmul.f32 %v347_v3, %v91_v2  ;;  %v603_v20 = vmul.f32 %v347_v3, %v219_v8  ;;  %v476_v25 = vmul.f32 %v348_v11, %v92_v10  ;;  %v222_v32 = vld [vmem:[#allocation5 + $0x130] sm:$0xff]  ;;  %v95_v34 = vld [vmem:[#allocation2 + $0x138] sm:$0xff]  ;;  %v96_v42 = vld [vmem:[#allocation2 + $0x140] sm:$0xff] }
  0x5e   :  { %v967_v47 = vadd.f32 %v966_v39, %v840_v30  ;;  %v848_v30 = vmul.f32 %v720_v13, %v720_v13  ;;  %v728_v13 = vsub.f32 %v472_v57, %v600_v60  ;;  %v604_v28 = vmul.f32 %v348_v11, %v220_v16  ;;  %v351_v35 = vld [vmem:[#allocation7 + $0x138] sm:$0xff]  ;;  %v352_v43 = vld [vmem:[#allocation7 + $0x140] sm:$0xff]  ;;  %v97_v50 = vld [vmem:[#allocation2 + $0x148] sm:$0xff] }
  0x5f   :  { %v477_v33 = vmul.f32 %v349_v19, %v93_v18  ;;  %v605_v36 = vmul.f32 %v349_v19, %v221_v24  ;;  %v223_v40 = vld [vmem:[#allocation5 + $0x138] sm:$0xff]  ;;  %v478_v41 = vmul.f32 %v350_v27, %v94_v26  ;;  %v606_v44 = vmul.f32 %v350_v27, %v222_v32  ;;  %v224_v48 = vld [vmem:[#allocation5 + $0x140] sm:$0xff]  ;;  %v353_v51 = vld [vmem:[#allocation7 + $0x148] sm:$0xff] }
  0x60   :  { %v968_v55 = vadd.f32 %v967_v47, %v841_v38  ;;  %v849_v38 = vmul.f32 %v721_v21, %v721_v21  ;;  %v729_v21 = vsub.f32 %v473_v1, %v601_v4  ;;  %v479_v49 = vmul.f32 %v351_v35, %v95_v34  ;;  %v225_v56 = vld [vmem:[#allocation5 + $0x148] sm:$0xff]  ;;  %v98_v58 = vld [vmem:[#allocation2 + $0x150] sm:$0xff]  ;;  %v99_v2 = vld [vmem:[#allocation2 + $0x158] sm:$0xff] }
  0x61   :  { %v607_v52 = vmul.f32 %v351_v35, %v223_v40  ;;  %v480_v57 = vmul.f32 %v352_v43, %v96_v42  ;;  %v354_v59 = vld [vmem:[#allocation7 + $0x150] sm:$0xff]  ;;  %v608_v60 = vmul.f32 %v352_v43, %v224_v48  ;;  %v481_v1 = vmul.f32 %v353_v51, %v97_v50  ;;  %v355_v3 = vld [vmem:[#allocation7 + $0x158] sm:$0xff]  ;;  %v100_v10 = vld [vmem:[#allocation2 + $0x160] sm:$0xff] }
  0x62   :  { %v969_v63 = vadd.f32 %v968_v55, %v842_v46  ;;  %v850_v46 = vmul.f32 %v722_v29, %v722_v29  ;;  %v730_v29 = vsub.f32 %v474_v9, %v602_v12  ;;  %v226_v0 = vld [vmem:[#allocation5 + $0x150] sm:$0xff]  ;;  %v609_v4 = vmul.f32 %v353_v51, %v225_v56  ;;  %v227_v8 = vld [vmem:[#allocation5 + $0x158] sm:$0xff]  ;;  %v356_v11 = vld [vmem:[#allocation7 + $0x160] sm:$0xff] }
  0x63   :  { %v482_v9 = vmul.f32 %v354_v59, %v98_v58  ;;  %v610_v12 = vmul.f32 %v354_v59, %v226_v0  ;;  %v228_v16 = vld [vmem:[#allocation5 + $0x160] sm:$0xff]  ;;  %v101_v18 = vld [vmem:[#allocation2 + $0x168] sm:$0xff]  ;;  %v102_v26 = vld [vmem:[#allocation2 + $0x170] sm:$0xff] }
  0x64   :  { %v970_v7 = vadd.f32 %v969_v63, %v843_v54  ;;  %v851_v54 = vmul.f32 %v723_v37, %v723_v37  ;;  %v731_v37 = vsub.f32 %v475_v17, %v603_v20  ;;  %v483_v17 = vmul.f32 %v355_v3, %v99_v2  ;;  %v357_v19 = vld [vmem:[#allocation7 + $0x168] sm:$0xff]  ;;  %v358_v27 = vld [vmem:[#allocation7 + $0x170] sm:$0xff]  ;;  %v103_v34 = vld [vmem:[#allocation2 + $0x178] sm:$0xff] }
  0x65   :  { %v611_v20 = vmul.f32 %v355_v3, %v227_v8  ;;  %v229_v24 = vld [vmem:[#allocation5 + $0x168] sm:$0xff]  ;;  %v230_v32 = vld [vmem:[#allocation5 + $0x170] sm:$0xff]  ;;  %v359_v35 = vld [vmem:[#allocation7 + $0x178] sm:$0xff] }
  0x66   :  { %v971_v15 = vadd.f32 %v970_v7, %v844_v62  ;;  %v852_v62 = vmul.f32 %v724_v45, %v724_v45  ;;  %v732_v45 = vsub.f32 %v476_v25, %v604_v28  ;;  %v484_v25 = vmul.f32 %v356_v11, %v100_v10  ;;  %v231_v40 = vld [vmem:[#allocation5 + $0x178] sm:$0xff]  ;;  %v104_v42 = vld [vmem:[#allocation2 + $0x180] sm:$0xff]  ;;  %v105_v50 = vld [vmem:[#allocation2 + $0x188] sm:$0xff] }
  0x67   :  { %v612_v28 = vmul.f32 %v356_v11, %v228_v16  ;;  %v360_v43 = vld [vmem:[#allocation7 + $0x180] sm:$0xff]  ;;  %v361_v51 = vld [vmem:[#allocation7 + $0x188] sm:$0xff]  ;;  %v106_v58 = vld [vmem:[#allocation2 + $0x190] sm:$0xff] }
  0x68   :  { %v972_v23 = vadd.f32 %v971_v15, %v845_v6  ;;  %v853_v6 = vmul.f32 %v725_v53, %v725_v53  ;;  %v733_v53 = vsub.f32 %v477_v33, %v605_v36  ;;  %v485_v33 = vmul.f32 %v357_v19, %v101_v18  ;;  %v232_v48 = vld [vmem:[#allocation5 + $0x180] sm:$0xff]  ;;  %v233_v56 = vld [vmem:[#allocation5 + $0x188] sm:$0xff]  ;;  %v362_v59 = vld [vmem:[#allocation7 + $0x190] sm:$0xff] }
  0x69   :  { %v613_v36 = vmul.f32 %v357_v19, %v229_v24  ;;  %v234_v0 = vld [vmem:[#allocation5 + $0x190] sm:$0xff]  ;;  %v107_v2 = vld [vmem:[#allocation2 + $0x198] sm:$0xff]  ;;  %v108_v10 = vld [vmem:[#allocation2 + $0x1a0] sm:$0xff] }
  0x6a   :  { %v973_v31 = vadd.f32 %v972_v23, %v846_v14  ;;  %v854_v14 = vmul.f32 %v726_v61, %v726_v61  ;;  %v734_v61 = vsub.f32 %v478_v41, %v606_v44  ;;  %v486_v41 = vmul.f32 %v358_v27, %v102_v26  ;;  %v363_v3 = vld [vmem:[#allocation7 + $0x198] sm:$0xff]  ;;  %v364_v11 = vld [vmem:[#allocation7 + $0x1a0] sm:$0xff]  ;;  %v109_v18 = vld [vmem:[#allocation2 + $0x1a8] sm:$0xff] }
  0x6b   :  { %v614_v44 = vmul.f32 %v358_v27, %v230_v32  ;;  %v235_v8 = vld [vmem:[#allocation5 + $0x198] sm:$0xff]  ;;  %v236_v16 = vld [vmem:[#allocation5 + $0x1a0] sm:$0xff]  ;;  %v365_v19 = vld [vmem:[#allocation7 + $0x1a8] sm:$0xff] }
  0x6c   :  { %v974_v39 = vadd.f32 %v973_v31, %v847_v22  ;;  %v855_v22 = vmul.f32 %v727_v5, %v727_v5  ;;  %v735_v5 = vsub.f32 %v479_v49, %v607_v52  ;;  %v487_v49 = vmul.f32 %v359_v35, %v103_v34  ;;  %v237_v24 = vld [vmem:[#allocation5 + $0x1a8] sm:$0xff]  ;;  %v110_v26 = vld [vmem:[#allocation2 + $0x1b0] sm:$0xff]  ;;  %v111_v34 = vld [vmem:[#allocation2 + $0x1b8] sm:$0xff] }
  0x6d   :  { %v615_v52 = vmul.f32 %v359_v35, %v231_v40  ;;  %v366_v27 = vld [vmem:[#allocation7 + $0x1b0] sm:$0xff]  ;;  %v367_v35 = vld [vmem:[#allocation7 + $0x1b8] sm:$0xff] }
  0x6e   :  { %v975_v47 = vadd.f32 %v974_v39, %v848_v30  ;;  %v856_v30 = vmul.f32 %v728_v13, %v728_v13  ;;  %v736_v13 = vsub.f32 %v480_v57, %v608_v60  ;;  %v488_v57 = vmul.f32 %v360_v43, %v104_v42  ;;  %v238_v32 = vld [vmem:[#allocation5 + $0x1b0] sm:$0xff]  ;;  %v239_v40 = vld [vmem:[#allocation5 + $0x1b8] sm:$0xff]  ;;  %v112_v42 = vld [vmem:[#allocation2 + $0x1c0] sm:$0xff] }
  0x6f   :  { %v616_v60 = vmul.f32 %v360_v43, %v232_v48  ;;  %v368_v43 = vld [vmem:[#allocation7 + $0x1c0] sm:$0xff] }
  0x70   :  { %v976_v55 = vadd.f32 %v975_v47, %v849_v38  ;;  %v857_v38 = vmul.f32 %v729_v21, %v729_v21  ;;  %v737_v21 = vsub.f32 %v481_v1, %v609_v4  ;;  %v489_v1 = vmul.f32 %v361_v51, %v105_v50  ;;  %v240_v48 = vld [vmem:[#allocation5 + $0x1c0] sm:$0xff]  ;;  %v113_v50 = vld [vmem:[#allocation2 + $0x1c8] sm:$0xff] }
  0x71   :  { %v617_v4 = vmul.f32 %v361_v51, %v233_v56  ;;  %v369_v51 = vld [vmem:[#allocation7 + $0x1c8] sm:$0xff] }
  0x72   :  { %v977_v63 = vadd.f32 %v976_v55, %v850_v46  ;;  %v858_v46 = vmul.f32 %v730_v29, %v730_v29  ;;  %v738_v29 = vsub.f32 %v482_v9, %v610_v12  ;;  %v490_v9 = vmul.f32 %v362_v59, %v106_v58  ;;  %v241_v56 = vld [vmem:[#allocation5 + $0x1c8] sm:$0xff]  ;;  %v114_v58 = vld [vmem:[#allocation2 + $0x1d0] sm:$0xff] }
  0x73   :  { %v618_v12 = vmul.f32 %v362_v59, %v234_v0  ;;  %v370_v59 = vld [vmem:[#allocation7 + $0x1d0] sm:$0xff] }
  0x74   :  { %v978_v7 = vadd.f32 %v977_v63, %v851_v54  ;;  %v859_v54 = vmul.f32 %v731_v37, %v731_v37  ;;  %v739_v37 = vsub.f32 %v483_v17, %v611_v20  ;;  %v491_v17 = vmul.f32 %v363_v3, %v107_v2  ;;  %v242_v0 = vld [vmem:[#allocation5 + $0x1d0] sm:$0xff]  ;;  %v115_v2 = vld [vmem:[#allocation2 + $0x1d8] sm:$0xff] }
  0x75   :  { %v619_v20 = vmul.f32 %v363_v3, %v235_v8  ;;  %v371_v3 = vld [vmem:[#allocation7 + $0x1d8] sm:$0xff] }
  0x76   :  { %v979_v15 = vadd.f32 %v978_v7, %v852_v62  ;;  %v860_v62 = vmul.f32 %v732_v45, %v732_v45  ;;  %v740_v45 = vsub.f32 %v484_v25, %v612_v28  ;;  %v492_v25 = vmul.f32 %v364_v11, %v108_v10  ;;  %v243_v8 = vld [vmem:[#allocation5 + $0x1d8] sm:$0xff]  ;;  %v116_v10 = vld [vmem:[#allocation2 + $0x1e0] sm:$0xff] }
  0x77   :  { %v620_v28 = vmul.f32 %v364_v11, %v236_v16  ;;  %v372_v11 = vld [vmem:[#allocation7 + $0x1e0] sm:$0xff] }
  0x78   :  { %v980_v23 = vadd.f32 %v979_v15, %v853_v6  ;;  %v861_v6 = vmul.f32 %v733_v53, %v733_v53  ;;  %v741_v53 = vsub.f32 %v485_v33, %v613_v36  ;;  %v493_v33 = vmul.f32 %v365_v19, %v109_v18  ;;  %v244_v16 = vld [vmem:[#allocation5 + $0x1e0] sm:$0xff]  ;;  %v117_v18 = vld [vmem:[#allocation2 + $0x1e8] sm:$0xff] }
  0x79   :  { %v621_v36 = vmul.f32 %v365_v19, %v237_v24  ;;  %v373_v19 = vld [vmem:[#allocation7 + $0x1e8] sm:$0xff] }
  0x7a   :  { %v981_v31 = vadd.f32 %v980_v23, %v854_v14  ;;  %v862_v14 = vmul.f32 %v734_v61, %v734_v61  ;;  %v742_v61 = vsub.f32 %v486_v41, %v614_v44  ;;  %v494_v41 = vmul.f32 %v366_v27, %v110_v26  ;;  %v245_v24 = vld [vmem:[#allocation5 + $0x1e8] sm:$0xff]  ;;  %v118_v26 = vld [vmem:[#allocation2 + $0x1f0] sm:$0xff] }
  0x7b   :  { %v622_v44 = vmul.f32 %v366_v27, %v238_v32  ;;  %v374_v27 = vld [vmem:[#allocation7 + $0x1f0] sm:$0xff] }
  0x7c   :  { %v982_v39 = vadd.f32 %v981_v31, %v855_v22  ;;  %v863_v22 = vmul.f32 %v735_v5, %v735_v5  ;;  %v743_v5 = vsub.f32 %v487_v49, %v615_v52  ;;  %v495_v49 = vmul.f32 %v367_v35, %v111_v34  ;;  %v246_v32 = vld [vmem:[#allocation5 + $0x1f0] sm:$0xff]  ;;  %v119_v34 = vld [vmem:[#allocation2 + $0x1f8] sm:$0xff] }
  0x7d   :  { %v623_v52 = vmul.f32 %v367_v35, %v239_v40  ;;  %v375_v35 = vld [vmem:[#allocation7 + $0x1f8] sm:$0xff] }
  0x7e   :  { %v983_v47 = vadd.f32 %v982_v39, %v856_v30  ;;  %v864_v30 = vmul.f32 %v736_v13, %v736_v13  ;;  %v744_v13 = vsub.f32 %v488_v57, %v616_v60  ;;  %v496_v57 = vmul.f32 %v368_v43, %v112_v42  ;;  %v247_v40 = vld [vmem:[#allocation5 + $0x1f8] sm:$0xff]  ;;  %v120_v42 = vld [vmem:[#allocation2 + $0x200] sm:$0xff] }
  0x7f   :  { %v624_v60 = vmul.f32 %v368_v43, %v240_v48  ;;  %v376_v43 = vld [vmem:[#allocation7 + $0x200] sm:$0xff] }
  0x80   :  { %v984_v55 = vadd.f32 %v983_v47, %v857_v38  ;;  %v865_v38 = vmul.f32 %v737_v21, %v737_v21  ;;  %v745_v21 = vsub.f32 %v489_v1, %v617_v4  ;;  %v497_v1 = vmul.f32 %v369_v51, %v113_v50  ;;  %v248_v48 = vld [vmem:[#allocation5 + $0x200] sm:$0xff]  ;;  %v121_v50 = vld [vmem:[#allocation2 + $0x208] sm:$0xff] }
  0x81   :  { %v625_v4 = vmul.f32 %v369_v51, %v241_v56  ;;  %v377_v51 = vld [vmem:[#allocation7 + $0x208] sm:$0xff] }
  0x82   :  { %v985_v63 = vadd.f32 %v984_v55, %v858_v46  ;;  %v866_v46 = vmul.f32 %v738_v29, %v738_v29  ;;  %v746_v29 = vsub.f32 %v490_v9, %v618_v12  ;;  %v498_v9 = vmul.f32 %v370_v59, %v114_v58  ;;  %v249_v56 = vld [vmem:[#allocation5 + $0x208] sm:$0xff]  ;;  %v122_v58 = vld [vmem:[#allocation2 + $0x210] sm:$0xff] }
  0x83   :  { %v626_v12 = vmul.f32 %v370_v59, %v242_v0  ;;  %v378_v59 = vld [vmem:[#allocation7 + $0x210] sm:$0xff] }
  0x84   :  { %v986_v7 = vadd.f32 %v985_v63, %v859_v54  ;;  %v867_v54 = vmul.f32 %v739_v37, %v739_v37  ;;  %v747_v37 = vsub.f32 %v491_v17, %v619_v20  ;;  %v499_v17 = vmul.f32 %v371_v3, %v115_v2  ;;  %v250_v0 = vld [vmem:[#allocation5 + $0x210] sm:$0xff]  ;;  %v123_v2 = vld [vmem:[#allocation2 + $0x218] sm:$0xff] }
  0x85   :  { %v627_v20 = vmul.f32 %v371_v3, %v243_v8  ;;  %v379_v3 = vld [vmem:[#allocation7 + $0x218] sm:$0xff] }
  0x86   :  { %v987_v15 = vadd.f32 %v986_v7, %v860_v62  ;;  %v868_v62 = vmul.f32 %v740_v45, %v740_v45  ;;  %v748_v45 = vsub.f32 %v492_v25, %v620_v28  ;;  %v500_v25 = vmul.f32 %v372_v11, %v116_v10  ;;  %v251_v8 = vld [vmem:[#allocation5 + $0x218] sm:$0xff]  ;;  %v124_v10 = vld [vmem:[#allocation2 + $0x220] sm:$0xff] }
  0x87   :  { %v628_v28 = vmul.f32 %v372_v11, %v244_v16  ;;  %v380_v11 = vld [vmem:[#allocation7 + $0x220] sm:$0xff] }
  0x88   :  { %v988_v23 = vadd.f32 %v987_v15, %v861_v6  ;;  %v869_v6 = vmul.f32 %v741_v53, %v741_v53  ;;  %v749_v53 = vsub.f32 %v493_v33, %v621_v36  ;;  %v501_v33 = vmul.f32 %v373_v19, %v117_v18  ;;  %v252_v16 = vld [vmem:[#allocation5 + $0x220] sm:$0xff]  ;;  %v125_v18 = vld [vmem:[#allocation2 + $0x228] sm:$0xff] }
  0x89   :  { %v629_v36 = vmul.f32 %v373_v19, %v245_v24  ;;  %v381_v19 = vld [vmem:[#allocation7 + $0x228] sm:$0xff] }
  0x8a   :  { %v989_v31 = vadd.f32 %v988_v23, %v862_v14  ;;  %v870_v14 = vmul.f32 %v742_v61, %v742_v61  ;;  %v750_v61 = vsub.f32 %v494_v41, %v622_v44  ;;  %v502_v41 = vmul.f32 %v374_v27, %v118_v26  ;;  %v253_v24 = vld [vmem:[#allocation5 + $0x228] sm:$0xff]  ;;  %v126_v26 = vld [vmem:[#allocation2 + $0x230] sm:$0xff] }
  0x8b   :  { %v630_v44 = vmul.f32 %v374_v27, %v246_v32  ;;  %v382_v27 = vld [vmem:[#allocation7 + $0x230] sm:$0xff] }
  0x8c   :  { %v990_v39 = vadd.f32 %v989_v31, %v863_v22  ;;  %v871_v22 = vmul.f32 %v743_v5, %v743_v5  ;;  %v751_v5 = vsub.f32 %v495_v49, %v623_v52  ;;  %v503_v49 = vmul.f32 %v375_v35, %v119_v34  ;;  %v254_v32 = vld [vmem:[#allocation5 + $0x230] sm:$0xff]  ;;  %v127_v34 = vld [vmem:[#allocation2 + $0x238] sm:$0xff] }
  0x8d   :  { %v631_v52 = vmul.f32 %v375_v35, %v247_v40  ;;  %v383_v35 = vld [vmem:[#allocation7 + $0x238] sm:$0xff] }
  0x8e   :  { %v991_v47 = vadd.f32 %v990_v39, %v864_v30  ;;  %v872_v30 = vmul.f32 %v744_v13, %v744_v13  ;;  %v752_v13 = vsub.f32 %v496_v57, %v624_v60  ;;  %v504_v57 = vmul.f32 %v376_v43, %v120_v42  ;;  %v255_v40 = vld [vmem:[#allocation5 + $0x238] sm:$0xff]  ;;  %v128_v42 = vld [vmem:[#allocation2 + $0x240] sm:$0xff] }
  0x8f   :  { %v632_v60 = vmul.f32 %v376_v43, %v248_v48  ;;  %v384_v43 = vld [vmem:[#allocation7 + $0x240] sm:$0xff] }
  0x90   :  { %v992_v55 = vadd.f32 %v991_v47, %v865_v38  ;;  %v873_v38 = vmul.f32 %v745_v21, %v745_v21  ;;  %v753_v21 = vsub.f32 %v497_v1, %v625_v4  ;;  %v505_v1 = vmul.f32 %v377_v51, %v121_v50  ;;  %v256_v48 = vld [vmem:[#allocation5 + $0x240] sm:$0xff]  ;;  %v129_v50 = vld [vmem:[#allocation2 + $0x248] sm:$0xff] }
  0x91   :  { %v633_v4 = vmul.f32 %v377_v51, %v249_v56  ;;  %v385_v51 = vld [vmem:[#allocation7 + $0x248] sm:$0xff] }
  0x92   :  { %v993_v63 = vadd.f32 %v992_v55, %v866_v46  ;;  %v874_v46 = vmul.f32 %v746_v29, %v746_v29  ;;  %v754_v29 = vsub.f32 %v498_v9, %v626_v12  ;;  %v506_v9 = vmul.f32 %v378_v59, %v122_v58  ;;  %v257_v56 = vld [vmem:[#allocation5 + $0x248] sm:$0xff]  ;;  %v130_v58 = vld [vmem:[#allocation2 + $0x250] sm:$0xff] }
  0x93   :  { %v634_v12 = vmul.f32 %v378_v59, %v250_v0  ;;  %v386_v59 = vld [vmem:[#allocation7 + $0x250] sm:$0xff] }
  0x94   :  { %v994_v7 = vadd.f32 %v993_v63, %v867_v54  ;;  %v875_v54 = vmul.f32 %v747_v37, %v747_v37  ;;  %v755_v37 = vsub.f32 %v499_v17, %v627_v20  ;;  %v507_v17 = vmul.f32 %v379_v3, %v123_v2  ;;  %v258_v0 = vld [vmem:[#allocation5 + $0x250] sm:$0xff]  ;;  %v131_v2 = vld [vmem:[#allocation2 + $0x258] sm:$0xff] }
  0x95   :  { %v635_v20 = vmul.f32 %v379_v3, %v251_v8  ;;  %v387_v3 = vld [vmem:[#allocation7 + $0x258] sm:$0xff] }
  0x96   :  { %v995_v15 = vadd.f32 %v994_v7, %v868_v62  ;;  %v876_v62 = vmul.f32 %v748_v45, %v748_v45  ;;  %v756_v45 = vsub.f32 %v500_v25, %v628_v28  ;;  %v508_v25 = vmul.f32 %v380_v11, %v124_v10  ;;  %v259_v8 = vld [vmem:[#allocation5 + $0x258] sm:$0xff]  ;;  %v132_v10 = vld [vmem:[#allocation2 + $0x260] sm:$0xff] }
  0x97   :  { %v636_v28 = vmul.f32 %v380_v11, %v252_v16  ;;  %v388_v11 = vld [vmem:[#allocation7 + $0x260] sm:$0xff] }
  0x98   :  { %v996_v23 = vadd.f32 %v995_v15, %v869_v6  ;;  %v877_v6 = vmul.f32 %v749_v53, %v749_v53  ;;  %v757_v53 = vsub.f32 %v501_v33, %v629_v36  ;;  %v509_v33 = vmul.f32 %v381_v19, %v125_v18  ;;  %v260_v16 = vld [vmem:[#allocation5 + $0x260] sm:$0xff]  ;;  %v133_v18 = vld [vmem:[#allocation2 + $0x268] sm:$0xff] }
  0x99   :  { %v637_v36 = vmul.f32 %v381_v19, %v253_v24  ;;  %v389_v19 = vld [vmem:[#allocation7 + $0x268] sm:$0xff] }
  0x9a   :  { %v997_v31 = vadd.f32 %v996_v23, %v870_v14  ;;  %v878_v14 = vmul.f32 %v750_v61, %v750_v61  ;;  %v758_v61 = vsub.f32 %v502_v41, %v630_v44  ;;  %v510_v41 = vmul.f32 %v382_v27, %v126_v26  ;;  %v261_v24 = vld [vmem:[#allocation5 + $0x268] sm:$0xff]  ;;  %v134_v26 = vld [vmem:[#allocation2 + $0x270] sm:$0xff] }
  0x9b   :  { %v638_v44 = vmul.f32 %v382_v27, %v254_v32  ;;  %v390_v27 = vld [vmem:[#allocation7 + $0x270] sm:$0xff] }
  0x9c   :  { %v998_v39 = vadd.f32 %v997_v31, %v871_v22  ;;  %v879_v22 = vmul.f32 %v751_v5, %v751_v5  ;;  %v759_v5 = vsub.f32 %v503_v49, %v631_v52  ;;  %v511_v49 = vmul.f32 %v383_v35, %v127_v34  ;;  %v262_v32 = vld [vmem:[#allocation5 + $0x270] sm:$0xff]  ;;  %v135_v34 = vld [vmem:[#allocation2 + $0x278] sm:$0xff] }
  0x9d   :  { %v639_v52 = vmul.f32 %v383_v35, %v255_v40  ;;  %v391_v35 = vld [vmem:[#allocation7 + $0x278] sm:$0xff] }
  0x9e   :  { %v999_v47 = vadd.f32 %v998_v39, %v872_v30  ;;  %v880_v30 = vmul.f32 %v752_v13, %v752_v13  ;;  %v760_v13 = vsub.f32 %v504_v57, %v632_v60  ;;  %v512_v57 = vmul.f32 %v384_v43, %v128_v42  ;;  %v263_v40 = vld [vmem:[#allocation5 + $0x278] sm:$0xff]  ;;  %v136_v42 = vld [vmem:[#allocation2 + $0x280] sm:$0xff] }
  0x9f   :  { %v640_v60 = vmul.f32 %v384_v43, %v256_v48  ;;  %v392_v43 = vld [vmem:[#allocation7 + $0x280] sm:$0xff] }
  0xa0   :  { %v1000_v55 = vadd.f32 %v999_v47, %v873_v38  ;;  %v881_v38 = vmul.f32 %v753_v21, %v753_v21  ;;  %v761_v21 = vsub.f32 %v505_v1, %v633_v4  ;;  %v513_v1 = vmul.f32 %v385_v51, %v129_v50  ;;  %v264_v48 = vld [vmem:[#allocation5 + $0x280] sm:$0xff]  ;;  %v137_v50 = vld [vmem:[#allocation2 + $0x288] sm:$0xff] }
  0xa1   :  { %v641_v4 = vmul.f32 %v385_v51, %v257_v56  ;;  %v393_v51 = vld [vmem:[#allocation7 + $0x288] sm:$0xff] }
  0xa2   :  { %v1001_v63 = vadd.f32 %v1000_v55, %v874_v46  ;;  %v882_v46 = vmul.f32 %v754_v29, %v754_v29  ;;  %v762_v29 = vsub.f32 %v506_v9, %v634_v12  ;;  %v514_v9 = vmul.f32 %v386_v59, %v130_v58  ;;  %v265_v56 = vld [vmem:[#allocation5 + $0x288] sm:$0xff]  ;;  %v138_v58 = vld [vmem:[#allocation2 + $0x290] sm:$0xff] }
  0xa3   :  { %v642_v12 = vmul.f32 %v386_v59, %v258_v0  ;;  %v394_v59 = vld [vmem:[#allocation7 + $0x290] sm:$0xff] }
  0xa4   :  { %v1002_v7 = vadd.f32 %v1001_v63, %v875_v54  ;;  %v883_v54 = vmul.f32 %v755_v37, %v755_v37  ;;  %v763_v37 = vsub.f32 %v507_v17, %v635_v20  ;;  %v515_v17 = vmul.f32 %v387_v3, %v131_v2  ;;  %v266_v0 = vld [vmem:[#allocation5 + $0x290] sm:$0xff]  ;;  %v139_v2 = vld [vmem:[#allocation2 + $0x298] sm:$0xff] }
  0xa5   :  { %v643_v20 = vmul.f32 %v387_v3, %v259_v8  ;;  %v395_v3 = vld [vmem:[#allocation7 + $0x298] sm:$0xff] }
  0xa6   :  { %v1003_v15 = vadd.f32 %v1002_v7, %v876_v62  ;;  %v884_v62 = vmul.f32 %v756_v45, %v756_v45  ;;  %v764_v45 = vsub.f32 %v508_v25, %v636_v28  ;;  %v516_v25 = vmul.f32 %v388_v11, %v132_v10  ;;  %v267_v8 = vld [vmem:[#allocation5 + $0x298] sm:$0xff]  ;;  %v140_v10 = vld [vmem:[#allocation2 + $0x2a0] sm:$0xff] }
  0xa7   :  { %v644_v28 = vmul.f32 %v388_v11, %v260_v16  ;;  %v396_v11 = vld [vmem:[#allocation7 + $0x2a0] sm:$0xff] }
  0xa8   :  { %v1004_v23 = vadd.f32 %v1003_v15, %v877_v6  ;;  %v885_v6 = vmul.f32 %v757_v53, %v757_v53  ;;  %v765_v53 = vsub.f32 %v509_v33, %v637_v36  ;;  %v517_v33 = vmul.f32 %v389_v19, %v133_v18  ;;  %v268_v16 = vld [vmem:[#allocation5 + $0x2a0] sm:$0xff]  ;;  %v141_v18 = vld [vmem:[#allocation2 + $0x2a8] sm:$0xff] }
  0xa9   :  { %v645_v36 = vmul.f32 %v389_v19, %v261_v24  ;;  %v397_v19 = vld [vmem:[#allocation7 + $0x2a8] sm:$0xff] }
  0xaa   :  { %v1005_v31 = vadd.f32 %v1004_v23, %v878_v14  ;;  %v886_v14 = vmul.f32 %v758_v61, %v758_v61  ;;  %v766_v61 = vsub.f32 %v510_v41, %v638_v44  ;;  %v518_v41 = vmul.f32 %v390_v27, %v134_v26  ;;  %v269_v24 = vld [vmem:[#allocation5 + $0x2a8] sm:$0xff]  ;;  %v142_v26 = vld [vmem:[#allocation2 + $0x2b0] sm:$0xff] }
  0xab   :  { %v646_v44 = vmul.f32 %v390_v27, %v262_v32  ;;  %v398_v27 = vld [vmem:[#allocation7 + $0x2b0] sm:$0xff] }
  0xac   :  { %v1006_v39 = vadd.f32 %v1005_v31, %v879_v22  ;;  %v887_v22 = vmul.f32 %v759_v5, %v759_v5  ;;  %v767_v5 = vsub.f32 %v511_v49, %v639_v52  ;;  %v519_v49 = vmul.f32 %v391_v35, %v135_v34  ;;  %v270_v32 = vld [vmem:[#allocation5 + $0x2b0] sm:$0xff]  ;;  %v143_v34 = vld [vmem:[#allocation2 + $0x2b8] sm:$0xff] }
  0xad   :  { %v647_v52 = vmul.f32 %v391_v35, %v263_v40  ;;  %v399_v35 = vld [vmem:[#allocation7 + $0x2b8] sm:$0xff] }
  0xae   :  { %v1007_v47 = vadd.f32 %v1006_v39, %v880_v30  ;;  %v888_v30 = vmul.f32 %v760_v13, %v760_v13  ;;  %v768_v13 = vsub.f32 %v512_v57, %v640_v60  ;;  %v520_v57 = vmul.f32 %v392_v43, %v136_v42  ;;  %v271_v40 = vld [vmem:[#allocation5 + $0x2b8] sm:$0xff]  ;;  %v144_v42 = vld [vmem:[#allocation2 + $0x2c0] sm:$0xff] }
  0xaf   :  { %v648_v60 = vmul.f32 %v392_v43, %v264_v48  ;;  %v400_v43 = vld [vmem:[#allocation7 + $0x2c0] sm:$0xff] }
  0xb0   :  { %v1008_v55 = vadd.f32 %v1007_v47, %v881_v38  ;;  %v889_v38 = vmul.f32 %v761_v21, %v761_v21  ;;  %v769_v21 = vsub.f32 %v513_v1, %v641_v4  ;;  %v521_v1 = vmul.f32 %v393_v51, %v137_v50  ;;  %v272_v48 = vld [vmem:[#allocation5 + $0x2c0] sm:$0xff]  ;;  %v145_v50 = vld [vmem:[#allocation2 + $0x2c8] sm:$0xff] }
  0xb1   :  { %v649_v4 = vmul.f32 %v393_v51, %v265_v56  ;;  %v401_v51 = vld [vmem:[#allocation7 + $0x2c8] sm:$0xff] }
  0xb2   :  { %v1009_v63 = vadd.f32 %v1008_v55, %v882_v46  ;;  %v890_v46 = vmul.f32 %v762_v29, %v762_v29  ;;  %v770_v29 = vsub.f32 %v514_v9, %v642_v12  ;;  %v522_v9 = vmul.f32 %v394_v59, %v138_v58  ;;  %v273_v56 = vld [vmem:[#allocation5 + $0x2c8] sm:$0xff]  ;;  %v146_v58 = vld [vmem:[#allocation2 + $0x2d0] sm:$0xff] }
  0xb3   :  { %v650_v12 = vmul.f32 %v394_v59, %v266_v0  ;;  %v402_v59 = vld [vmem:[#allocation7 + $0x2d0] sm:$0xff] }
  0xb4   :  { %v1010_v7 = vadd.f32 %v1009_v63, %v883_v54  ;;  %v891_v54 = vmul.f32 %v763_v37, %v763_v37  ;;  %v771_v37 = vsub.f32 %v515_v17, %v643_v20  ;;  %v523_v17 = vmul.f32 %v395_v3, %v139_v2  ;;  %v274_v0 = vld [vmem:[#allocation5 + $0x2d0] sm:$0xff]  ;;  %v147_v2 = vld [vmem:[#allocation2 + $0x2d8] sm:$0xff] }
  0xb5   :  { %v651_v20 = vmul.f32 %v395_v3, %v267_v8  ;;  %v403_v3 = vld [vmem:[#allocation7 + $0x2d8] sm:$0xff] }
  0xb6   :  { %v1011_v15 = vadd.f32 %v1010_v7, %v884_v62  ;;  %v892_v62 = vmul.f32 %v764_v45, %v764_v45  ;;  %v772_v45 = vsub.f32 %v516_v25, %v644_v28  ;;  %v524_v25 = vmul.f32 %v396_v11, %v140_v10  ;;  %v275_v8 = vld [vmem:[#allocation5 + $0x2d8] sm:$0xff]  ;;  %v148_v10 = vld [vmem:[#allocation2 + $0x2e0] sm:$0xff] }
  0xb7   :  { %v652_v28 = vmul.f32 %v396_v11, %v268_v16  ;;  %v404_v11 = vld [vmem:[#allocation7 + $0x2e0] sm:$0xff] }
  0xb8   :  { %v1012_v23 = vadd.f32 %v1011_v15, %v885_v6  ;;  %v893_v6 = vmul.f32 %v765_v53, %v765_v53  ;;  %v773_v53 = vsub.f32 %v517_v33, %v645_v36  ;;  %v525_v33 = vmul.f32 %v397_v19, %v141_v18  ;;  %v276_v16 = vld [vmem:[#allocation5 + $0x2e0] sm:$0xff]  ;;  %v149_v18 = vld [vmem:[#allocation2 + $0x2e8] sm:$0xff] }
  0xb9   :  { %v653_v36 = vmul.f32 %v397_v19, %v269_v24  ;;  %v405_v19 = vld [vmem:[#allocation7 + $0x2e8] sm:$0xff] }
  0xba   :  { %v1013_v31 = vadd.f32 %v1012_v23, %v886_v14  ;;  %v894_v14 = vmul.f32 %v766_v61, %v766_v61  ;;  %v774_v61 = vsub.f32 %v518_v41, %v646_v44  ;;  %v526_v41 = vmul.f32 %v398_v27, %v142_v26  ;;  %v277_v24 = vld [vmem:[#allocation5 + $0x2e8] sm:$0xff]  ;;  %v150_v26 = vld [vmem:[#allocation2 + $0x2f0] sm:$0xff] }
  0xbb   :  { %v654_v44 = vmul.f32 %v398_v27, %v270_v32  ;;  %v406_v27 = vld [vmem:[#allocation7 + $0x2f0] sm:$0xff] }
  0xbc   :  { %v1014_v39 = vadd.f32 %v1013_v31, %v887_v22  ;;  %v895_v22 = vmul.f32 %v767_v5, %v767_v5  ;;  %v775_v5 = vsub.f32 %v519_v49, %v647_v52  ;;  %v527_v49 = vmul.f32 %v399_v35, %v143_v34  ;;  %v278_v32 = vld [vmem:[#allocation5 + $0x2f0] sm:$0xff]  ;;  %v151_v34 = vld [vmem:[#allocation2 + $0x2f8] sm:$0xff] }
  0xbd   :  { %v655_v52 = vmul.f32 %v399_v35, %v271_v40  ;;  %v407_v35 = vld [vmem:[#allocation7 + $0x2f8] sm:$0xff] }
  0xbe   :  { %v1015_v47 = vadd.f32 %v1014_v39, %v888_v30  ;;  %v896_v30 = vmul.f32 %v768_v13, %v768_v13  ;;  %v776_v13 = vsub.f32 %v520_v57, %v648_v60  ;;  %v528_v57 = vmul.f32 %v400_v43, %v144_v42  ;;  %v279_v40 = vld [vmem:[#allocation5 + $0x2f8] sm:$0xff]  ;;  %v152_v42 = vld [vmem:[#allocation2 + $0x300] sm:$0xff] }
  0xbf   :  { %v656_v60 = vmul.f32 %v400_v43, %v272_v48  ;;  %v408_v43 = vld [vmem:[#allocation7 + $0x300] sm:$0xff] }
  0xc0   :  { %v1016_v55 = vadd.f32 %v1015_v47, %v889_v38  ;;  %v897_v38 = vmul.f32 %v769_v21, %v769_v21  ;;  %v777_v21 = vsub.f32 %v521_v1, %v649_v4  ;;  %v529_v1 = vmul.f32 %v401_v51, %v145_v50  ;;  %v280_v48 = vld [vmem:[#allocation5 + $0x300] sm:$0xff]  ;;  %v153_v50 = vld [vmem:[#allocation2 + $0x308] sm:$0xff] }
  0xc1   :  { %v657_v4 = vmul.f32 %v401_v51, %v273_v56  ;;  %v409_v51 = vld [vmem:[#allocation7 + $0x308] sm:$0xff] }
  0xc2   :  { %v1017_v63 = vadd.f32 %v1016_v55, %v890_v46  ;;  %v898_v46 = vmul.f32 %v770_v29, %v770_v29  ;;  %v778_v29 = vsub.f32 %v522_v9, %v650_v12  ;;  %v530_v9 = vmul.f32 %v402_v59, %v146_v58  ;;  %v281_v56 = vld [vmem:[#allocation5 + $0x308] sm:$0xff]  ;;  %v154_v58 = vld [vmem:[#allocation2 + $0x310] sm:$0xff] }
  0xc3   :  { %v658_v12 = vmul.f32 %v402_v59, %v274_v0  ;;  %v410_v59 = vld [vmem:[#allocation7 + $0x310] sm:$0xff] }
  0xc4   :  { %v1018_v7 = vadd.f32 %v1017_v63, %v891_v54  ;;  %v899_v54 = vmul.f32 %v771_v37, %v771_v37  ;;  %v779_v37 = vsub.f32 %v523_v17, %v651_v20  ;;  %v531_v17 = vmul.f32 %v403_v3, %v147_v2  ;;  %v282_v0 = vld [vmem:[#allocation5 + $0x310] sm:$0xff]  ;;  %v155_v2 = vld [vmem:[#allocation2 + $0x318] sm:$0xff] }
  0xc5   :  { %v659_v20 = vmul.f32 %v403_v3, %v275_v8  ;;  %v411_v3 = vld [vmem:[#allocation7 + $0x318] sm:$0xff] }
  0xc6   :  { %v1019_v15 = vadd.f32 %v1018_v7, %v892_v62  ;;  %v900_v62 = vmul.f32 %v772_v45, %v772_v45  ;;  %v780_v45 = vsub.f32 %v524_v25, %v652_v28  ;;  %v532_v25 = vmul.f32 %v404_v11, %v148_v10  ;;  %v283_v8 = vld [vmem:[#allocation5 + $0x318] sm:$0xff]  ;;  %v156_v10 = vld [vmem:[#allocation2 + $0x320] sm:$0xff] }
  0xc7   :  { %v660_v28 = vmul.f32 %v404_v11, %v276_v16  ;;  %v412_v11 = vld [vmem:[#allocation7 + $0x320] sm:$0xff] }
  0xc8   :  { %v1020_v23 = vadd.f32 %v1019_v15, %v893_v6  ;;  %v901_v6 = vmul.f32 %v773_v53, %v773_v53  ;;  %v781_v53 = vsub.f32 %v525_v33, %v653_v36  ;;  %v533_v33 = vmul.f32 %v405_v19, %v149_v18  ;;  %v284_v16 = vld [vmem:[#allocation5 + $0x320] sm:$0xff]  ;;  %v157_v18 = vld [vmem:[#allocation2 + $0x328] sm:$0xff] }
  0xc9   :  { %v661_v36 = vmul.f32 %v405_v19, %v277_v24  ;;  %v413_v19 = vld [vmem:[#allocation7 + $0x328] sm:$0xff] }
  0xca   :  { %v1021_v31 = vadd.f32 %v1020_v23, %v894_v14  ;;  %v902_v14 = vmul.f32 %v774_v61, %v774_v61  ;;  %v782_v61 = vsub.f32 %v526_v41, %v654_v44  ;;  %v534_v41 = vmul.f32 %v406_v27, %v150_v26  ;;  %v285_v24 = vld [vmem:[#allocation5 + $0x328] sm:$0xff]  ;;  %v158_v26 = vld [vmem:[#allocation2 + $0x330] sm:$0xff] }
  0xcb   :  { %v662_v44 = vmul.f32 %v406_v27, %v278_v32  ;;  %v414_v27 = vld [vmem:[#allocation7 + $0x330] sm:$0xff] }
  0xcc   :  { %v1022_v39 = vadd.f32 %v1021_v31, %v895_v22  ;;  %v903_v22 = vmul.f32 %v775_v5, %v775_v5  ;;  %v783_v5 = vsub.f32 %v527_v49, %v655_v52  ;;  %v535_v49 = vmul.f32 %v407_v35, %v151_v34  ;;  %v286_v32 = vld [vmem:[#allocation5 + $0x330] sm:$0xff]  ;;  %v159_v34 = vld [vmem:[#allocation2 + $0x338] sm:$0xff] }
  0xcd   :  { %v663_v52 = vmul.f32 %v407_v35, %v279_v40  ;;  %v415_v35 = vld [vmem:[#allocation7 + $0x338] sm:$0xff] }
  0xce   :  { %v1023_v47 = vadd.f32 %v1022_v39, %v896_v30  ;;  %v904_v30 = vmul.f32 %v776_v13, %v776_v13  ;;  %v784_v13 = vsub.f32 %v528_v57, %v656_v60  ;;  %v536_v57 = vmul.f32 %v408_v43, %v152_v42  ;;  %v287_v40 = vld [vmem:[#allocation5 + $0x338] sm:$0xff]  ;;  %v160_v42 = vld [vmem:[#allocation2 + $0x340] sm:$0xff] }
  0xcf   :  { %v664_v60 = vmul.f32 %v408_v43, %v280_v48  ;;  %v416_v43 = vld [vmem:[#allocation7 + $0x340] sm:$0xff] }
  0xd0   :  { %v1024_v55 = vadd.f32 %v1023_v47, %v897_v38  ;;  %v905_v38 = vmul.f32 %v777_v21, %v777_v21  ;;  %v785_v21 = vsub.f32 %v529_v1, %v657_v4  ;;  %v537_v1 = vmul.f32 %v409_v51, %v153_v50  ;;  %v288_v48 = vld [vmem:[#allocation5 + $0x340] sm:$0xff]  ;;  %v161_v50 = vld [vmem:[#allocation2 + $0x348] sm:$0xff] }
  0xd1   :  { %v665_v4 = vmul.f32 %v409_v51, %v281_v56  ;;  %v417_v51 = vld [vmem:[#allocation7 + $0x348] sm:$0xff] }
  0xd2   :  { %v1025_v63 = vadd.f32 %v1024_v55, %v898_v46  ;;  %v906_v46 = vmul.f32 %v778_v29, %v778_v29  ;;  %v786_v29 = vsub.f32 %v530_v9, %v658_v12  ;;  %v538_v9 = vmul.f32 %v410_v59, %v154_v58  ;;  %v289_v56 = vld [vmem:[#allocation5 + $0x348] sm:$0xff]  ;;  %v162_v58 = vld [vmem:[#allocation2 + $0x350] sm:$0xff] }
  0xd3   :  { %v666_v12 = vmul.f32 %v410_v59, %v282_v0  ;;  %v418_v59 = vld [vmem:[#allocation7 + $0x350] sm:$0xff] }
  0xd4   :  { %v1026_v7 = vadd.f32 %v1025_v63, %v899_v54  ;;  %v907_v54 = vmul.f32 %v779_v37, %v779_v37  ;;  %v787_v37 = vsub.f32 %v531_v17, %v659_v20  ;;  %v539_v17 = vmul.f32 %v411_v3, %v155_v2  ;;  %v290_v0 = vld [vmem:[#allocation5 + $0x350] sm:$0xff]  ;;  %v163_v2 = vld [vmem:[#allocation2 + $0x358] sm:$0xff] }
  0xd5   :  { %v667_v20 = vmul.f32 %v411_v3, %v283_v8  ;;  %v419_v3 = vld [vmem:[#allocation7 + $0x358] sm:$0xff] }
  0xd6   :  { %v1027_v15 = vadd.f32 %v1026_v7, %v900_v62  ;;  %v908_v62 = vmul.f32 %v780_v45, %v780_v45  ;;  %v788_v45 = vsub.f32 %v532_v25, %v660_v28  ;;  %v540_v25 = vmul.f32 %v412_v11, %v156_v10  ;;  %v291_v8 = vld [vmem:[#allocation5 + $0x358] sm:$0xff]  ;;  %v164_v10 = vld [vmem:[#allocation2 + $0x360] sm:$0xff] }
  0xd7   :  { %v668_v28 = vmul.f32 %v412_v11, %v284_v16  ;;  %v420_v11 = vld [vmem:[#allocation7 + $0x360] sm:$0xff] }
  0xd8   :  { %v1028_v23 = vadd.f32 %v1027_v15, %v901_v6  ;;  %v909_v6 = vmul.f32 %v781_v53, %v781_v53  ;;  %v789_v53 = vsub.f32 %v533_v33, %v661_v36  ;;  %v541_v33 = vmul.f32 %v413_v19, %v157_v18  ;;  %v292_v16 = vld [vmem:[#allocation5 + $0x360] sm:$0xff]  ;;  %v165_v18 = vld [vmem:[#allocation2 + $0x368] sm:$0xff] }
  0xd9   :  { %v669_v36 = vmul.f32 %v413_v19, %v285_v24  ;;  %v421_v19 = vld [vmem:[#allocation7 + $0x368] sm:$0xff] }
  0xda   :  { %v1029_v31 = vadd.f32 %v1028_v23, %v902_v14  ;;  %v910_v14 = vmul.f32 %v782_v61, %v782_v61  ;;  %v790_v61 = vsub.f32 %v534_v41, %v662_v44  ;;  %v542_v41 = vmul.f32 %v414_v27, %v158_v26  ;;  %v293_v24 = vld [vmem:[#allocation5 + $0x368] sm:$0xff]  ;;  %v166_v26 = vld [vmem:[#allocation2 + $0x370] sm:$0xff] }
  0xdb   :  { %v670_v44 = vmul.f32 %v414_v27, %v286_v32  ;;  %v422_v27 = vld [vmem:[#allocation7 + $0x370] sm:$0xff] }
  0xdc   :  { %v1030_v39 = vadd.f32 %v1029_v31, %v903_v22  ;;  %v911_v22 = vmul.f32 %v783_v5, %v783_v5  ;;  %v791_v5 = vsub.f32 %v535_v49, %v663_v52  ;;  %v543_v49 = vmul.f32 %v415_v35, %v159_v34  ;;  %v294_v32 = vld [vmem:[#allocation5 + $0x370] sm:$0xff]  ;;  %v167_v34 = vld [vmem:[#allocation2 + $0x378] sm:$0xff] }
  0xdd   :  { %v671_v52 = vmul.f32 %v415_v35, %v287_v40  ;;  %v423_v35 = vld [vmem:[#allocation7 + $0x378] sm:$0xff] }
  0xde   :  { %v1031_v47 = vadd.f32 %v1030_v39, %v904_v30  ;;  %v912_v30 = vmul.f32 %v784_v13, %v784_v13  ;;  %v792_v13 = vsub.f32 %v536_v57, %v664_v60  ;;  %v544_v57 = vmul.f32 %v416_v43, %v160_v42  ;;  %v295_v40 = vld [vmem:[#allocation5 + $0x378] sm:$0xff]  ;;  %v168_v42 = vld [vmem:[#allocation2 + $0x380] sm:$0xff] }
  0xdf   :  { %v672_v60 = vmul.f32 %v416_v43, %v288_v48  ;;  %v424_v43 = vld [vmem:[#allocation7 + $0x380] sm:$0xff] }
  0xe0   :  { %v1032_v55 = vadd.f32 %v1031_v47, %v905_v38  ;;  %v913_v38 = vmul.f32 %v785_v21, %v785_v21  ;;  %v793_v21 = vsub.f32 %v537_v1, %v665_v4  ;;  %v545_v1 = vmul.f32 %v417_v51, %v161_v50  ;;  %v296_v48 = vld [vmem:[#allocation5 + $0x380] sm:$0xff]  ;;  %v169_v50 = vld [vmem:[#allocation2 + $0x388] sm:$0xff] }
  0xe1   :  { %v673_v4 = vmul.f32 %v417_v51, %v289_v56  ;;  %v425_v51 = vld [vmem:[#allocation7 + $0x388] sm:$0xff] }
  0xe2   :  { %v1033_v63 = vadd.f32 %v1032_v55, %v906_v46  ;;  %v914_v46 = vmul.f32 %v786_v29, %v786_v29  ;;  %v794_v29 = vsub.f32 %v538_v9, %v666_v12  ;;  %v546_v9 = vmul.f32 %v418_v59, %v162_v58  ;;  %v297_v56 = vld [vmem:[#allocation5 + $0x388] sm:$0xff]  ;;  %v170_v58 = vld [vmem:[#allocation2 + $0x390] sm:$0xff] }
  0xe3   :  { %v674_v12 = vmul.f32 %v418_v59, %v290_v0  ;;  %v426_v59 = vld [vmem:[#allocation7 + $0x390] sm:$0xff] }
  0xe4   :  { %v1034_v7 = vadd.f32 %v1033_v63, %v907_v54  ;;  %v915_v54 = vmul.f32 %v787_v37, %v787_v37  ;;  %v795_v37 = vsub.f32 %v539_v17, %v667_v20  ;;  %v547_v17 = vmul.f32 %v419_v3, %v163_v2  ;;  %v298_v0 = vld [vmem:[#allocation5 + $0x390] sm:$0xff]  ;;  %v171_v2 = vld [vmem:[#allocation2 + $0x398] sm:$0xff] }
  0xe5   :  { %v675_v20 = vmul.f32 %v419_v3, %v291_v8  ;;  %v427_v3 = vld [vmem:[#allocation7 + $0x398] sm:$0xff] }
  0xe6   :  { %v1035_v15 = vadd.f32 %v1034_v7, %v908_v62  ;;  %v916_v62 = vmul.f32 %v788_v45, %v788_v45  ;;  %v796_v45 = vsub.f32 %v540_v25, %v668_v28  ;;  %v548_v25 = vmul.f32 %v420_v11, %v164_v10  ;;  %v299_v8 = vld [vmem:[#allocation5 + $0x398] sm:$0xff]  ;;  %v172_v10 = vld [vmem:[#allocation2 + $0x3a0] sm:$0xff] }
  0xe7   :  { %v676_v28 = vmul.f32 %v420_v11, %v292_v16  ;;  %v428_v11 = vld [vmem:[#allocation7 + $0x3a0] sm:$0xff] }
  0xe8   :  { %v1036_v23 = vadd.f32 %v1035_v15, %v909_v6  ;;  %v917_v6 = vmul.f32 %v789_v53, %v789_v53  ;;  %v797_v53 = vsub.f32 %v541_v33, %v669_v36  ;;  %v549_v33 = vmul.f32 %v421_v19, %v165_v18  ;;  %v300_v16 = vld [vmem:[#allocation5 + $0x3a0] sm:$0xff]  ;;  %v173_v18 = vld [vmem:[#allocation2 + $0x3a8] sm:$0xff] }
  0xe9   :  { %v677_v36 = vmul.f32 %v421_v19, %v293_v24  ;;  %v429_v19 = vld [vmem:[#allocation7 + $0x3a8] sm:$0xff] }
  0xea   :  { %v1037_v31 = vadd.f32 %v1036_v23, %v910_v14  ;;  %v918_v14 = vmul.f32 %v790_v61, %v790_v61  ;;  %v798_v61 = vsub.f32 %v542_v41, %v670_v44  ;;  %v550_v41 = vmul.f32 %v422_v27, %v166_v26  ;;  %v301_v24 = vld [vmem:[#allocation5 + $0x3a8] sm:$0xff]  ;;  %v174_v26 = vld [vmem:[#allocation2 + $0x3b0] sm:$0xff] }
  0xeb   :  { %v678_v44 = vmul.f32 %v422_v27, %v294_v32  ;;  %v430_v27 = vld [vmem:[#allocation7 + $0x3b0] sm:$0xff] }
  0xec   :  { %v1038_v39 = vadd.f32 %v1037_v31, %v911_v22  ;;  %v919_v22 = vmul.f32 %v791_v5, %v791_v5  ;;  %v799_v5 = vsub.f32 %v543_v49, %v671_v52  ;;  %v551_v49 = vmul.f32 %v423_v35, %v167_v34  ;;  %v302_v32 = vld [vmem:[#allocation5 + $0x3b0] sm:$0xff]  ;;  %v175_v34 = vld [vmem:[#allocation2 + $0x3b8] sm:$0xff] }
  0xed   :  { %v679_v52 = vmul.f32 %v423_v35, %v295_v40  ;;  %v431_v35 = vld [vmem:[#allocation7 + $0x3b8] sm:$0xff] }
  0xee   :  { %v1039_v47 = vadd.f32 %v1038_v39, %v912_v30  ;;  %v920_v30 = vmul.f32 %v792_v13, %v792_v13  ;;  %v800_v13 = vsub.f32 %v544_v57, %v672_v60  ;;  %v552_v57 = vmul.f32 %v424_v43, %v168_v42  ;;  %v303_v40 = vld [vmem:[#allocation5 + $0x3b8] sm:$0xff]  ;;  %v176_v42 = vld [vmem:[#allocation2 + $0x3c0] sm:$0xff] }
  0xef   :  { %v680_v60 = vmul.f32 %v424_v43, %v296_v48  ;;  %v432_v43 = vld [vmem:[#allocation7 + $0x3c0] sm:$0xff] }
  0xf0   :  { %v1040_v55 = vadd.f32 %v1039_v47, %v913_v38  ;;  %v921_v38 = vmul.f32 %v793_v21, %v793_v21  ;;  %v801_v21 = vsub.f32 %v545_v1, %v673_v4  ;;  %v553_v1 = vmul.f32 %v425_v51, %v169_v50  ;;  %v304_v48 = vld [vmem:[#allocation5 + $0x3c0] sm:$0xff]  ;;  %v177_v50 = vld [vmem:[#allocation2 + $0x3c8] sm:$0xff] }
  0xf1   :  { %v681_v4 = vmul.f32 %v425_v51, %v297_v56  ;;  %v433_v51 = vld [vmem:[#allocation7 + $0x3c8] sm:$0xff] }
  0xf2   :  { %v1041_v63 = vadd.f32 %v1040_v55, %v914_v46  ;;  %v922_v46 = vmul.f32 %v794_v29, %v794_v29  ;;  %v802_v29 = vsub.f32 %v546_v9, %v674_v12  ;;  %v554_v9 = vmul.f32 %v426_v59, %v170_v58  ;;  %v305_v56 = vld [vmem:[#allocation5 + $0x3c8] sm:$0xff]  ;;  %v178_v58 = vld [vmem:[#allocation2 + $0x3d0] sm:$0xff] }
  0xf3   :  { %v682_v12 = vmul.f32 %v426_v59, %v298_v0  ;;  %v434_v59 = vld [vmem:[#allocation7 + $0x3d0] sm:$0xff] }
  0xf4   :  { %v1042_v7 = vadd.f32 %v1041_v63, %v915_v54  ;;  %v923_v54 = vmul.f32 %v795_v37, %v795_v37  ;;  %v803_v37 = vsub.f32 %v547_v17, %v675_v20  ;;  %v555_v17 = vmul.f32 %v427_v3, %v171_v2  ;;  %v306_v0 = vld [vmem:[#allocation5 + $0x3d0] sm:$0xff]  ;;  %v179_v2 = vld [vmem:[#allocation2 + $0x3d8] sm:$0xff] }
  0xf5   :  { %v683_v20 = vmul.f32 %v427_v3, %v299_v8  ;;  %v435_v3 = vld [vmem:[#allocation7 + $0x3d8] sm:$0xff] }
  0xf6   :  { %v1043_v15 = vadd.f32 %v1042_v7, %v916_v62  ;;  %v924_v62 = vmul.f32 %v796_v45, %v796_v45  ;;  %v804_v45 = vsub.f32 %v548_v25, %v676_v28  ;;  %v556_v25 = vmul.f32 %v428_v11, %v172_v10  ;;  %v307_v8 = vld [vmem:[#allocation5 + $0x3d8] sm:$0xff]  ;;  %v180_v10 = vld [vmem:[#allocation2 + $0x3e0] sm:$0xff] }
  0xf7   :  { %v684_v28 = vmul.f32 %v428_v11, %v300_v16  ;;  %v436_v11 = vld [vmem:[#allocation7 + $0x3e0] sm:$0xff] }
  0xf8   :  { %v1044_v23 = vadd.f32 %v1043_v15, %v917_v6  ;;  %v925_v6 = vmul.f32 %v797_v53, %v797_v53  ;;  %v805_v53 = vsub.f32 %v549_v33, %v677_v36  ;;  %v557_v33 = vmul.f32 %v429_v19, %v173_v18  ;;  %v308_v16 = vld [vmem:[#allocation5 + $0x3e0] sm:$0xff]  ;;  %v181_v18 = vld [vmem:[#allocation2 + $0x3e8] sm:$0xff] }
  0xf9   :  { %v685_v36 = vmul.f32 %v429_v19, %v301_v24  ;;  %v437_v19 = vld [vmem:[#allocation7 + $0x3e8] sm:$0xff] }
  0xfa   :  { %v1045_v31 = vadd.f32 %v1044_v23, %v918_v14  ;;  %v926_v14 = vmul.f32 %v798_v61, %v798_v61  ;;  %v806_v61 = vsub.f32 %v550_v41, %v678_v44  ;;  %v558_v41 = vmul.f32 %v430_v27, %v174_v26  ;;  %v309_v24 = vld [vmem:[#allocation5 + $0x3e8] sm:$0xff]  ;;  %v182_v26 = vld [vmem:[#allocation2 + $0x3f0] sm:$0xff] }
  0xfb   :  { %v686_v44 = vmul.f32 %v430_v27, %v302_v32  ;;  %v438_v27 = vld [vmem:[#allocation7 + $0x3f0] sm:$0xff] }
  0xfc   :  { %v1046_v39 = vadd.f32 %v1045_v31, %v919_v22  ;;  %v927_v22 = vmul.f32 %v799_v5, %v799_v5  ;;  %v807_v5 = vsub.f32 %v551_v49, %v679_v52  ;;  %v559_v49 = vmul.f32 %v431_v35, %v175_v34  ;;  %v310_v32 = vld [vmem:[#allocation5 + $0x3f0] sm:$0xff]  ;;  %v183_v34 = vld [vmem:[#allocation2 + $0x3f8] sm:$0xff] }
  0xfd   :  { %v687_v52 = vmul.f32 %v431_v35, %v303_v40  ;;  %v439_v35 = vld [vmem:[#allocation7 + $0x3f8] sm:$0xff] }
  0xfe   :  { %v1047_v47 = vadd.f32 %v1046_v39, %v920_v30  ;;  %v928_v30 = vmul.f32 %v800_v13, %v800_v13  ;;  %v808_v13 = vsub.f32 %v552_v57, %v680_v60  ;;  %v560_v57 = vmul.f32 %v432_v43, %v176_v42  ;;  %v311_v40 = vld [vmem:[#allocation5 + $0x3f8] sm:$0xff] }
  0xff   :  { %v688_v60 = vmul.f32 %v432_v43, %v304_v48  ;;  %v694_v42 = vmul.f32 %v438_v27, %v310_v32 }
 0x100   :  { %v1048_v55 = vadd.f32 %v1047_v47, %v921_v38  ;;  %v929_v38 = vmul.f32 %v801_v21, %v801_v21  ;;  %v809_v21 = vsub.f32 %v553_v1, %v681_v4  ;;  %v561_v1 = vmul.f32 %v433_v51, %v177_v50 }
 0x101   :  { %v689_v4 = vmul.f32 %v433_v51, %v305_v56 }
 0x102   :  { %v1049_v63 = vadd.f32 %v1048_v55, %v922_v46  ;;  %v930_v46 = vmul.f32 %v802_v29, %v802_v29  ;;  %v810_v29 = vsub.f32 %v554_v9, %v682_v12  ;;  %v562_v9 = vmul.f32 %v434_v59, %v178_v58 }
 0x103   :  { %v690_v12 = vmul.f32 %v434_v59, %v306_v0 }
 0x104   :  { %v1050_v7 = vadd.f32 %v1049_v63, %v923_v54  ;;  %v931_v54 = vmul.f32 %v803_v37, %v803_v37  ;;  %v811_v37 = vsub.f32 %v555_v17, %v683_v20  ;;  %v563_v17 = vmul.f32 %v435_v3, %v179_v2 }
 0x105   :  { %v691_v20 = vmul.f32 %v435_v3, %v307_v8 }
 0x106   :  { %v1051_v15 = vadd.f32 %v1050_v7, %v924_v62  ;;  %v932_v62 = vmul.f32 %v804_v45, %v804_v45  ;;  %v812_v45 = vsub.f32 %v556_v25, %v684_v28  ;;  %v564_v25 = vmul.f32 %v436_v11, %v180_v10 }
 0x107   :  { %v692_v28 = vmul.f32 %v436_v11, %v308_v16 }
 0x108   :  { %v1052_v23 = vadd.f32 %v1051_v15, %v925_v6  ;;  %v933_v6 = vmul.f32 %v805_v53, %v805_v53  ;;  %v813_v53 = vsub.f32 %v557_v33, %v685_v36  ;;  %v565_v33 = vmul.f32 %v437_v19, %v181_v18 }
 0x109   :  { %v693_v36 = vmul.f32 %v437_v19, %v309_v24  ;;  %v820_v43 = vsub.f32 %v564_v25, %v692_v28 }
 0x10a   :  { %v1053_v31 = vadd.f32 %v1052_v23, %v926_v14  ;;  %v934_v14 = vmul.f32 %v806_v61, %v806_v61  ;;  %v814_v61 = vsub.f32 %v558_v41, %v686_v44  ;;  %v566_v41 = vmul.f32 %v438_v27, %v182_v26 }
 0x10b   :  { %v821_v48 = vsub.f32 %v565_v33, %v693_v36 }
 0x10c   :  { %v1054_v39 = vadd.f32 %v1053_v31, %v927_v22  ;;  %v935_v22 = vmul.f32 %v807_v5, %v807_v5  ;;  %v815_v5 = vsub.f32 %v559_v49, %v687_v52  ;;  %v822_v51 = vsub.f32 %v566_v41, %v694_v42 }
 0x10d   :  { %v948_v52 = vmul.f32 %v820_v43, %v820_v43 }
 0x10e   :  { %v1055_v47 = vadd.f32 %v1054_v39, %v928_v30  ;;  %v936_v30 = vmul.f32 %v808_v13, %v808_v13  ;;  %v816_v13 = vsub.f32 %v560_v57, %v688_v60  ;;  %v950_v57 = vmul.f32 %v822_v51, %v822_v51 }
 0x110   :  { %v1056_v55 = vadd.f32 %v1055_v47, %v929_v38  ;;  %v937_v38 = vmul.f32 %v809_v21, %v809_v21  ;;  %v817_v21 = vsub.f32 %v561_v1, %v689_v4 }
 0x112   :  { %v1057_v63 = vadd.f32 %v1056_v55, %v930_v46  ;;  %v938_v46 = vmul.f32 %v810_v29, %v810_v29  ;;  %v818_v29 = vsub.f32 %v562_v9, %v690_v12 }
 0x114   :  { %v1058_v7 = vadd.f32 %v1057_v63, %v931_v54  ;;  %v939_v54 = vmul.f32 %v811_v37, %v811_v37  ;;  %v819_v37 = vsub.f32 %v563_v17, %v691_v20  ;;  %v946_v44 = vmul.f32 %v818_v29, %v818_v29 }
 0x116   :  { %v1059_v15 = vadd.f32 %v1058_v7, %v932_v62  ;;  %v940_v62 = vmul.f32 %v812_v45, %v812_v45  ;;  %v947_v49 = vmul.f32 %v819_v37, %v819_v37 }
 0x118   :  { %v1060_v23 = vadd.f32 %v1059_v15, %v933_v6  ;;  %v941_v6 = vmul.f32 %v813_v53, %v813_v53 }
 0x11a   :  { %v1061_v31 = vadd.f32 %v1060_v23, %v934_v14  ;;  %v942_v14 = vmul.f32 %v814_v61, %v814_v61 }
 0x11c   :  { %v1062_v39 = vadd.f32 %v1061_v31, %v935_v22  ;;  %v943_v22 = vmul.f32 %v815_v5, %v815_v5 }
 0x11e   :  { %v1063_v47 = vadd.f32 %v1062_v39, %v936_v30  ;;  %v944_v30 = vmul.f32 %v816_v13, %v816_v13 }
 0x120   :  { %v1064_v55 = vadd.f32 %v1063_v47, %v937_v38  ;;  %v945_v38 = vmul.f32 %v817_v21, %v817_v21  ;;  %v695_v47 = vmul.f32 %v439_v35, %v311_v40 }
 0x122   :  { %v1065_v63 = vadd.f32 %v1064_v55, %v938_v46  ;;  %v567_v46 = vmul.f32 %v439_v35, %v183_v34  ;;  %v949_v55 = vmul.f32 %v821_v48, %v821_v48 }
 0x124   :  { %v1066_v7 = vadd.f32 %v1065_v63, %v939_v54  ;;  %v823_v54 = vsub.f32 %v567_v46, %v695_v47 }
 0x126   :  { %v1067_v15 = vadd.f32 %v1066_v7, %v940_v62  ;;  %v951_v59 = vmul.f32 %v823_v54, %v823_v54 }
 0x128   :  { %v1068_v23 = vadd.f32 %v1067_v15, %v941_v6 }
 0x12a   :  { %v1069_v31 = vadd.f32 %v1068_v23, %v942_v14 }
 0x12c   :  { %v1070_v39 = vadd.f32 %v1069_v31, %v943_v22 }
 0x12e   :  { %v1071_v45 = vadd.f32 %v1070_v39, %v944_v30 }
 0x130   :  { %v1072_v50 = vadd.f32 %v1071_v45, %v945_v38 }
 0x132   :  { %v1073_v53 = vadd.f32 %v1072_v50, %v946_v44 }
 0x134   :  { %v1074_v56 = vadd.f32 %v1073_v53, %v947_v49 }
 0x136   :  { %v1075_v58 = vadd.f32 %v1074_v56, %v948_v52 }
 0x138   :  { %v1076_v60 = vadd.f32 %v1075_v58, %v949_v55 }
 0x13a   :  { %v1077_v61 = vadd.f32 %v1076_v60, %v950_v57 }
 0x13c   :  { %v1078_v62 = vadd.f32 %v1077_v61, %v951_v59 }
 0x13e   :  { %1079 = vst [vmem:[#allocation8] sm:$0xff] %v1078_v62 }
 0x13f   :  { %1179 = shalt.err (!%p1176_p0)
}
 0x140   :  { %s1180_s25 = scalar_lea.hbm %s1289_s3, 128 }
 0x141   :  { %p1181_p1 = scmp.ne.s32.totalorder %s1289_s3, %s1180_s25  ;;  %p1184_p2 = scmp.lt.u32.totalorder %s1180_s25, %s1289_s3 }
 0x143   :  { %p1186_p3 = pnand %p1184_p2, %p1181_p1 }
 0x145   :  { %1189 = shalt.err (!%p1186_p3)
}
 0x146   :  { %1089 = dma.vmem_to_hbm [thread:$0]  %s1087_s21, 128, %s1289_s3, [#allocation4]  }
 0x147   :  { %1194 = dma.done.wait [#allocation4], 128  }
 0x148   :  { %1195 = vsyncadd [#allocation4], 4294967168 }
 0x149   :  { %1093 = vsyncpa [#allocation3], 1 }
 0x14a   :  { %1094 = vsyncpa [#allocation6], 1 }
 0x14b   :  { %1095 = vsyncpa [#allocation4], 1 }

</bundles_post_ra>
